<compile_context>
chip_gen: v5e
topology: v5e:2x2
jax: 0.10.0
libtpu: 0.0.40
codegen_flags: <defaults>
</compile_context>

<pallas_src>
import functools
import math
from itertools import count

import jax
import jax.numpy as jnp
from jax.experimental import pallas as pl
from jax.experimental.pallas import tpu as pltpu


# ----------------------------------------------------------------------------
# Pallas kernels
# ----------------------------------------------------------------------------

def _matmul_bn_act_kernel(*refs, relu, has_residual):
    """Tiled GEMM (bf16 in, f32 acc) with fused folded-BN scale/bias,
    optional fused residual add, optional ReLU."""
    if has_residual:
        a_ref, b_ref, scale_ref, bias_ref, id_ref, o_ref, acc_ref = refs
    else:
        a_ref, b_ref, scale_ref, bias_ref, o_ref, acc_ref = refs
        id_ref = None
    k = pl.program_id(2)

    @pl.when(k == 0)
    def _():
        acc_ref[...] = jnp.zeros_like(acc_ref)

    acc_ref[...] += jnp.dot(a_ref[...], b_ref[...],
                            preferred_element_type=jnp.float32)

    @pl.when(k == pl.num_programs(2) - 1)
    def _():
        y = acc_ref[...] * scale_ref[...] + bias_ref[...]
        if has_residual:
            y = y + id_ref[...].astype(jnp.float32)
        if relu:
            y = jnp.maximum(y, 0.0)
        o_ref[...] = y.astype(o_ref.dtype)


def _window_max_kernel(p_ref, o_ref):
    # p_ref: (tm, 9, C) -> max over the pooling-window axis
    o_ref[...] = jnp.max(p_ref[...], axis=1)


def _global_avg_kernel(x_ref, o_ref):
    # x_ref: (B, H*W, tc) -> mean over spatial, f32 output
    o_ref[...] = jnp.mean(x_ref[...].astype(jnp.float32), axis=1, keepdims=True)


def _global_max_kernel(x_ref, o_ref):
    o_ref[...] = jnp.max(x_ref[...].astype(jnp.float32), axis=1, keepdims=True)


# ----------------------------------------------------------------------------
# Tiling helpers
# ----------------------------------------------------------------------------

def _round_up(x, m):
    return (x + m - 1) // m * m


def _pad_and_tile(d, mult, max_tile):
    """Return (padded_dim, tile) with tile a multiple of `mult`, tile <= max_tile,
    padded_dim a multiple of tile, minimizing padding waste."""
    dp = _round_up(d, mult)
    if dp <= max_tile:
        return dp, dp
    best = None
    t = (max_tile // mult) * mult
    while t >= mult:
        padded = _round_up(dp, t)
        if best is None or padded < best[0]:
            best = (padded, t)
        t -= mult
    return best


# ----------------------------------------------------------------------------
# Pallas wrappers
# ----------------------------------------------------------------------------

_VMEM_LIMIT = 48 * 1024 * 1024   # well under v7x's 64 MiB physical VMEM


def _matmul_bn_act(a, b, scale, bias, residual, *, relu):
    """a:(M,K) @ b:(K,N), then *scale + bias (per-N), optional +residual, optional ReLU.
    Inputs are cast to bf16; accumulation is f32; output is bf16."""
    M, K = a.shape
    K2, N = b.shape
    assert K == K2
    # bf16 operands: second-to-last (sublane) dims need multiples of 16.
    Mp, tm = _pad_and_tile(M, 16, 512)
    Np, tn = _pad_and_tile(N, 128, 512)
    Kp, tk = _pad_and_tile(K, 128, 512)

    a_p = jnp.pad(a.astype(jnp.bfloat16), ((0, Mp - M), (0, Kp - K)))
    b_p = jnp.pad(b.astype(jnp.bfloat16), ((0, Kp - K), (0, Np - N)))
    s_p = jnp.pad(scale.astype(jnp.float32), (0, Np - N)).reshape(1, Np)
    d_p = jnp.pad(bias.astype(jnp.float32), (0, Np - N)).reshape(1, Np)

    has_res = residual is not None
    inputs = [a_p, b_p, s_p, d_p]
    in_specs = [
        pl.BlockSpec((tm, tk), lambda i, j, k: (i, k)),
        pl.BlockSpec((tk, tn), lambda i, j, k: (k, j)),
        pl.BlockSpec((1, tn), lambda i, j, k: (0, j)),
        pl.BlockSpec((1, tn), lambda i, j, k: (0, j)),
    ]
    if has_res:
        r_p = jnp.pad(residual.astype(jnp.bfloat16), ((0, Mp - M), (0, Np - N)))
        inputs.append(r_p)
        in_specs.append(pl.BlockSpec((tm, tn), lambda i, j, k: (i, j)))

    grid = (Mp // tm, Np // tn, Kp // tk)
    out = pl.pallas_call(
        functools.partial(_matmul_bn_act_kernel, relu=relu, has_residual=has_res),
        out_shape=jax.ShapeDtypeStruct((Mp, Np), jnp.bfloat16),
        grid_spec=pltpu.PrefetchScalarGridSpec(
            num_scalar_prefetch=0,
            grid=grid,
            in_specs=in_specs,
            out_specs=pl.BlockSpec((tm, tn), lambda i, j, k: (i, j)),
            scratch_shapes=[pltpu.VMEM((tm, tn), jnp.float32)],
        ),
        compiler_params=pltpu.CompilerParams(
            dimension_semantics=("parallel", "parallel", "arbitrary"),
            vmem_limit_bytes=_VMEM_LIMIT),
    )(*inputs)
    return out[:M, :N]


def _extract_patches(x, kh, kw, stride, padding, pad_value=0.0):
    """x: NHWC -> patches (B, Ho, Wo, kh*kw, C)  (pure glue).
    TODO(synk): for 3x3 convs this still materializes a kh*kw-expanded (bf16) tensor in
    HBM; a fully im2col-free version needs manual DMA of shifted windows (pl.ANY refs)."""
    B, H, W, C = x.shape
    if padding > 0:
        x = jnp.pad(x, ((0, 0), (padding, padding), (padding, padding), (0, 0)),
                    constant_values=pad_value)
    Ho = (H + 2 * padding - kh) // stride + 1
    Wo = (W + 2 * padding - kw) // stride + 1
    if kh == 1 and kw == 1:
        patches = x[:, ::stride, ::stride, :][..., None, :]   # (B, Ho, Wo, 1, C)
        return patches, Ho, Wo
    cols = []
    for i in range(kh):
        for j in range(kw):
            cols.append(x[:, i:i + stride * Ho:stride, j:j + stride * Wo:stride, :])
    patches = jnp.stack(cols, axis=3)  # (B, Ho, Wo, kh*kw, C)
    return patches, Ho, Wo


@functools.partial(jax.jit,
                   static_argnames=("kh", "kw", "stride", "padding", "relu"))
def conv_bn_act(x, wmat, scale, bias, residual=None, *,
                kh, kw, stride, padding, relu):
    """NHWC conv via im2col GEMM + folded BN (+ optional fused residual) (+ ReLU)."""
    B, H, W, Cin = x.shape
    Cout = wmat.shape[1]
    patches, Ho, Wo = _extract_patches(x, kh, kw, stride, padding)
    cols = patches.reshape(B * Ho * Wo, kh * kw * Cin)
    res2 = None if residual is None else residual.reshape(B * Ho * Wo, Cout)
    y = _matmul_bn_act(cols, wmat, scale, bias, res2, relu=relu)
    return y.reshape(B, Ho, Wo, Cout)


@jax.jit
def max_pool_3x3_s2(x):
    B, H, W, C = x.shape
    patches, Ho, Wo = _extract_patches(x, 3, 3, 2, 1, pad_value=-jnp.inf)
    M = B * Ho * Wo
    Mp, tm = _pad_and_tile(M, 16, 512)
    p = jnp.pad(patches.reshape(M, 9, C), ((0, Mp - M), (0, 0), (0, 0)))
    out = pl.pallas_call(
        _window_max_kernel,
        out_shape=jax.ShapeDtypeStruct((Mp, C), x.dtype),
        grid_spec=pltpu.PrefetchScalarGridSpec(
            num_scalar_prefetch=0,
            grid=(Mp // tm,),
            in_specs=[pl.BlockSpec((tm, 9, C), lambda i: (i, 0, 0))],
            out_specs=pl.BlockSpec((tm, C), lambda i: (i, 0)),
        ),
        compiler_params=pltpu.CompilerParams(
            dimension_semantics=("parallel",),
            vmem_limit_bytes=_VMEM_LIMIT),
    )(p)
    return out[:M].reshape(B, Ho, Wo, C)


@functools.partial(jax.jit, static_argnames=("mode",))
def _global_pool(x, mode):
    """Adaptive (1,1) avg/max pool on NHWC features, tiled over channels."""
    B, H, W, C = x.shape
    HW = H * W
    x2 = x.reshape(B, HW, C)
    tc = 256 if C % 256 == 0 else C
    kern = _global_avg_kernel if mode == "avg" else _global_max_kernel
    out = pl.pallas_call(
        kern,
        out_shape=jax.ShapeDtypeStruct((B, 1, C), jnp.float32),
        grid_spec=pltpu.PrefetchScalarGridSpec(
            num_scalar_prefetch=0,
            grid=(C // tc,),
            in_specs=[pl.BlockSpec((B, HW, tc), lambda j: (0, 0, j))],
            out_specs=pl.BlockSpec((B, 1, tc), lambda j: (0, 0, j)),
        ),
        compiler_params=pltpu.CompilerParams(
            dimension_semantics=("parallel",),
            vmem_limit_bytes=_VMEM_LIMIT),
    )(x2)
    return out.reshape(B, 1, 1, C)


def adaptive_pool(x, out_hw, mode):
    """AdaptiveAvg/MaxPool2d on NHWC features."""
    B, H, W, C = x.shape
    oh, ow = out_hw
    if (oh, ow) == (1, 1):
        return _global_pool(x, mode)
    # TODO(synk): general (oh,ow) adaptive-pool regions computed in plain JAX glue
    # (ragged tiny reductions; negligible compute, no clean single Pallas tiling).
    rows = [(math.floor(i * H / oh), max(math.floor(i * H / oh) + 1, math.ceil((i + 1) * H / oh)))
            for i in range(oh)]
    cols = [(math.floor(j * W / ow), max(math.floor(j * W / ow) + 1, math.ceil((j + 1) * W / ow)))
            for j in range(ow)]
    out_rows = []
    for rs, re in rows:
        out_cols = []
        for cs, ce in cols:
            region = x[:, rs:re, cs:ce, :].astype(jnp.float32)
            v = jnp.mean(region, axis=(1, 2)) if mode == "avg" else jnp.max(region, axis=(1, 2))
            out_cols.append(v)
        out_rows.append(jnp.stack(out_cols, axis=1))
    return jnp.stack(out_rows, axis=1)  # (B, oh, ow, C) f32


# ----------------------------------------------------------------------------
# ResNet-152 (synthetic, deterministic parameters)
# ----------------------------------------------------------------------------

_BLOCKS = (3, 8, 36, 3)
_PLANES = (64, 128, 256, 512)
_EXPANSION = 4


def make_resnet152_params(key):
    cnt = count()

    def conv_p(cout, cin, kh, kw):
        kw_key = jax.random.fold_in(key, next(cnt))
        kg_key = jax.random.fold_in(key, next(cnt))
        kb_key = jax.random.fold_in(key, next(cnt))
        std = math.sqrt(2.0 / (cin * kh * kw))
        w = std * jax.random.normal(kw_key, (cout, cin, kh, kw), jnp.float32)
        # Pre-transpose once to the GEMM layout (kh*kw*Cin, Cout), stored in bf16.
        wmat = jnp.transpose(w, (2, 3, 1, 0)).reshape(kh * kw * cin, cout)
        wmat = wmat.astype(jnp.bfloat16)
        gamma = 1.0 + 0.1 * jax.random.normal(kg_key, (cout,), jnp.float32)
        beta = 0.01 * jax.random.normal(kb_key, (cout,), jnp.float32)
        # eval-mode BN folded: running_mean = 0, running_var = 1, eps = 1e-5
        scale = gamma / math.sqrt(1.0 + 1e-5)
        bias = beta
        return {"wmat": wmat, "scale": scale, "bias": bias}

    params = {"conv1": conv_p(64, 3, 7, 7), "layers": []}
    in_ch = 64
    for planes, nblocks, stride in zip(_PLANES, _BLOCKS, (1, 2, 2, 2)):
        layer = []
        for b in range(nblocks):
            s = stride if b == 0 else 1
            blk = {
                "stride": s,
                "conv1": conv_p(planes, in_ch, 1, 1),
                "conv2": conv_p(planes, planes, 3, 3),
                "conv3": conv_p(planes * _EXPANSION, planes, 1, 1),
            }
            if s != 1 or in_ch != planes * _EXPANSION:
                blk["downsample"] = conv_p(planes * _EXPANSION, in_ch, 1, 1)
            layer.append(blk)
            in_ch = planes * _EXPANSION
        params["layers"].append(layer)
    return params


def _bottleneck(x, p):
    # Compute the identity path first so it can be fused into conv3's GEMM epilogue.
    if "downsample" in p:
        ds = p["downsample"]
        identity = conv_bn_act(x, ds["wmat"], ds["scale"], ds["bias"],
                               kh=1, kw=1, stride=p["stride"], padding=0, relu=False)
    else:
        identity = x
    c1, c2, c3 = p["conv1"], p["conv2"], p["conv3"]
    out = conv_bn_act(x, c1["wmat"], c1["scale"], c1["bias"],
                      kh=1, kw=1, stride=1, padding=0, relu=True)
    out = conv_bn_act(out, c2["wmat"], c2["scale"], c2["bias"],
                      kh=3, kw=3, stride=p["stride"], padding=1, relu=True)
    # conv3 + BN + residual add + ReLU fused into one GEMM epilogue.
    out = conv_bn_act(out, c3["wmat"], c3["scale"], c3["bias"], identity,
                      kh=1, kw=1, stride=1, padding=0, relu=True)
    return out


def resnet152_backbone(params, image_nchw):
    # image_nchw: (B, 3, H, W) float32, exactly like PyTorch; convert to NHWC bf16.
    x = jnp.transpose(image_nchw, (0, 2, 3, 1)).astype(jnp.bfloat16)
    c1 = params["conv1"]
    x = conv_bn_act(x, c1["wmat"], c1["scale"], c1["bias"],
                    kh=7, kw=7, stride=2, padding=3, relu=True)
    x = max_pool_3x3_s2(x)
    for layer in params["layers"]:
        for blk in layer:
            x = _bottleneck(x, blk)
    return x  # NHWC bf16, C = 2048


_POOL_SHAPES = {1: (1, 1), 2: (2, 1), 3: (3, 1), 5: (5, 1), 7: (7, 1),
                4: (2, 2), 6: (3, 2), 8: (4, 2), 9: (3, 3)}


def resnet152_image_encoder_forward(cfg_params, params, image):
    feat = resnet152_backbone(params, image)           # (B, h, w, 2048) bf16
    nof = cfg_params["num_output_features"]
    mode = "avg" if cfg_params.get("pool_type", "avg") == "avg" else "max"
    if nof == -1:
        pooled = feat                                   # nn.Identity
    else:
        pooled = adaptive_pool(feat, _POOL_SHAPES[nof], mode)
    B, oh, ow, C = pooled.shape
    # torch: flatten(start_dim=2) on NCHW then transpose(1, 2) == NHWC (B, oh*ow, C)
    return pooled.reshape(B, oh * ow, C).astype(jnp.float32)


def image_encoder_forward(config, params, image):
    if config["type"] == "default":
        return image                                    # nn.Identity
    elif config["type"] == "resnet152":
        return resnet152_image_encoder_forward(config["params"], params, image)
    raise NotImplementedError("Unknown Image Encoder: %s" % config["type"])


# ----------------------------------------------------------------------------
# Demo
# ----------------------------------------------------------------------------

if __name__ == "__main__":
    config = {
        "type": "resnet152",
        "params": {"pretrained": False, "pool_type": "avg", "num_output_features": 1},
    }
    # Small input (ResNet-152 needs >= 32x32 so every stride-2 stage is valid).
    image = jax.random.normal(jax.random.PRNGKey(0), (2, 3, 64, 64), jnp.float32)
    params = make_resnet152_params(jax.random.PRNGKey(42))

    out = image_encoder_forward(config, params, image)
    out = jax.block_until_ready(out)

    assert out.shape == (2, 1, 2048), out.shape      # (B, num_output_features, out_dim)
    assert out.dtype == jnp.float32
    assert bool(jnp.all(jnp.isfinite(out)))
    print("KERNEL_OK")
</pallas_src>

<mosaic_0001>
module attributes {stable_mosaic.version = 11 : i64} {
  func.func @_matmul_bn_act_kernel(%arg0: i32, %arg1: i32, %arg2: i32, %arg3: memref<512x256xbf16, #tpu.memory_space<vmem>>, %arg4: memref<256x128xbf16, #tpu.memory_space<vmem>>, %arg5: memref<1x128xf32, #tpu.memory_space<vmem>>, %arg6: memref<1x128xf32, #tpu.memory_space<vmem>>, %arg7: memref<512x128xbf16, #tpu.memory_space<vmem>>, %arg8: memref<512x128xf32, #tpu.memory_space<vmem>>) attributes {dimension_semantics = [#tpu.dimension_semantics<parallel>, #tpu.dimension_semantics<parallel>, #tpu.dimension_semantics<arbitrary>], iteration_bounds = array<i64: 4, 1, 1>, scalar_prefetch = 0 : i64, scratch_operands = 1 : i64, tpu.core_type = #tpu.core_type<tc>, window_params = [{transform_indices = @transform_0, window_bounds = array<i64: 512, 256>}, {transform_indices = @transform_1, window_bounds = array<i64: 256, 128>}, {transform_indices = @transform_2, window_bounds = array<i64: 1, 128>}, {transform_indices = @transform_3, window_bounds = array<i64: 1, 128>}, {transform_indices = @transform_4, window_bounds = array<i64: 512, 128>}]} {
    %c0_i32 = arith.constant 0 : i32
    %0 = arith.cmpi eq, %arg2, %c0_i32 : i32
    %1 = arith.extui %0 : i1 to i32
    %c0_i32_0 = arith.constant 0 : i32
    %2 = arith.cmpi ne, %1, %c0_i32_0 : i32
    scf.if %2 {
      %cst_10 = arith.constant 0.000000e+00 : f32
      %12 = vector.broadcast %cst_10 : f32 to vector<512x128xf32>
      %c0_11 = arith.constant 0 : index
      %c0_12 = arith.constant 0 : index
      %13 = vector.load %arg8[%c0_11, %c0_12] : memref<512x128xf32, #tpu.memory_space<vmem>>, vector<512x128xf32>
      tpu.vector_store %arg8[%c0_11, %c0_12], %12 {strides = array<i32>} : memref<512x128xf32, #tpu.memory_space<vmem>>, vector<512x128xf32>,
    } else {
    }
    %c0 = arith.constant 0 : index
    %c0_1 = arith.constant 0 : index
    %3 = vector.load %arg8[%c0, %c0_1] : memref<512x128xf32, #tpu.memory_space<vmem>>, vector<512x128xf32>
    %c0_2 = arith.constant 0 : index
    %c0_3 = arith.constant 0 : index
    %4 = vector.load %arg3[%c0_2, %c0_3] : memref<512x256xbf16, #tpu.memory_space<vmem>>, vector<512x256xbf16>
    %c0_4 = arith.constant 0 : index
    %c0_5 = arith.constant 0 : index
    %5 = vector.load %arg4[%c0_4, %c0_5] : memref<256x128xbf16, #tpu.memory_space<vmem>>, vector<256x128xbf16>
    %cst = arith.constant dense<0.000000e+00> : vector<512x128xf32>
    %6 = tpu.matmul %4, %5, %cst {dimension_numbers = #tpu.dot_dimension_numbers<[1], [0], [0], [1], [0, 0, 1, 1], [], []>} : vector<512x256xbf16>, vector<256x128xbf16>, vector<512x128xf32> -> vector<512x128xf32>
    %7 = arith.addf %3, %6 : vector<512x128xf32>
    %c0_6 = arith.constant 0 : index
    %c0_7 = arith.constant 0 : index
    %8 = vector.load %arg8[%c0_6, %c0_7] : memref<512x128xf32, #tpu.memory_space<vmem>>, vector<512x128xf32>
    tpu.vector_store %arg8[%c0_6, %c0_7], %7 {strides = array<i32>} : memref<512x128xf32, #tpu.memory_space<vmem>>, vector<512x128xf32>,
    %c0_i32_8 = arith.constant 0 : i32
    %9 = arith.cmpi eq, %arg2, %c0_i32_8 : i32
    %10 = arith.extui %9 : i1 to i32
    %c0_i32_9 = arith.constant 0 : i32
    %11 = arith.cmpi ne, %10, %c0_i32_9 : i32
    scf.if %11 {
      %c0_10 = arith.constant 0 : index
      %c0_11 = arith.constant 0 : index
      %12 = vector.load %arg8[%c0_10, %c0_11] : memref<512x128xf32, #tpu.memory_space<vmem>>, vector<512x128xf32>
      %c0_12 = arith.constant 0 : index
      %c0_13 = arith.constant 0 : index
      %13 = vector.load %arg5[%c0_12, %c0_13] : memref<1x128xf32, #tpu.memory_space<vmem>>, vector<1x128xf32>
      %14 = vector.broadcast %13 : vector<1x128xf32> to vector<512x128xf32>
      %15 = arith.mulf %12, %14 : vector<512x128xf32>
      %c0_14 = arith.constant 0 : index
      %c0_15 = arith.constant 0 : index
      %16 = vector.load %arg6[%c0_14, %c0_15] : memref<1x128xf32, #tpu.memory_space<vmem>>, vector<1x128xf32>
      %17 = vector.broadcast %16 : vector<1x128xf32> to vector<512x128xf32>
      %18 = arith.addf %15, %17 : vector<512x128xf32>
      %cst_16 = arith.constant 0.000000e+00 : f32
      %19 = vector.broadcast %cst_16 : f32 to vector<512x128xf32>
      %20 = arith.maximumf %18, %19 : vector<512x128xf32>
      %21 = arith.truncf %20 : vector<512x128xf32> to vector<512x128xbf16>
      %c0_17 = arith.constant 0 : index
      %c0_18 = arith.constant 0 : index
      %22 = vector.load %arg7[%c0_17, %c0_18] : memref<512x128xbf16, #tpu.memory_space<vmem>>, vector<512x128xbf16>
      tpu.vector_store %arg7[%c0_17, %c0_18], %21 {strides = array<i32>} : memref<512x128xbf16, #tpu.memory_space<vmem>>, vector<512x128xbf16>,
    } else {
    }
    return
  }
  func.func @transform_0(%arg0: i32, %arg1: i32, %arg2: i32) -> (i32, i32) {
    %c0_i32 = arith.constant 0 : i32
    return %arg0, %arg2 : i32, i32
  }
  func.func @transform_1(%arg0: i32, %arg1: i32, %arg2: i32) -> (i32, i32) {
    %c0_i32 = arith.constant 0 : i32
    return %arg2, %arg1 : i32, i32
  }
  func.func @transform_2(%arg0: i32, %arg1: i32, %arg2: i32) -> (i32, i32) {
    %c0_i32 = arith.constant 0 : i32
    %c0_i32_0 = arith.constant 0 : i32
    return %c0_i32, %arg1 : i32, i32
  }
  func.func @transform_3(%arg0: i32, %arg1: i32, %arg2: i32) -> (i32, i32) {
    %c0_i32 = arith.constant 0 : i32
    %c0_i32_0 = arith.constant 0 : i32
    return %c0_i32, %arg1 : i32, i32
  }
  func.func @transform_4(%arg0: i32, %arg1: i32, %arg2: i32) -> (i32, i32) {
    %c0_i32 = arith.constant 0 : i32
    return %arg0, %arg1 : i32, i32
  }
}

</mosaic_0001>

<bundles_post_ra>
// kernel: conv_bn_act.1
= control target key start
LH: loop header
LB: loop body
LE: loop exit
PB: predicated region body
PF: predicated region fallthrough
CT: control target
= control target key end

     0   :  { %9 = vsyncpa [#allocation4], 0  ;;  %s3180_s0 = inlined_call_operand.vmem [shape: bf16[2048,256], index: 0, kind: input, shape index: {}]   ;;  %s3181_s1 = inlined_call_operand.vmem [shape: bf16[256,128], index: 1, kind: input, shape index: {}]   ;;  %s3182_s2 = inlined_call_operand.vmem [shape: f32[1,128], index: 2, kind: input, shape index: {}]   ;;  %s3183_s3 = inlined_call_operand.vmem [shape: f32[1,128], index: 3, kind: input, shape index: {}]   ;;  %s3184_s4 = inlined_call_operand.hbm [shape: bf16[2048,128], index: 4, kind: output, shape index: {}]  }
   0x1   :  { %11 = vsyncpa [#allocation4 + $0x1], 0  ;;  %s2739_s15 = smov 0   ;;  %s2741_s16 = smov 0  }
   0x2   :  { %s2743_s17 = smov 0   ;;  %s2745_s18 = smov 0  }
   0x3   :  { %s2747_s19 = smov 0   ;;  %s2749_s20 = smov 0  }
   0x4 LB: > { %s1945_s21 = sadd.s32 4294967295, %s2710_s20   ;;  %s1946_s22 = sadd.s32 4294967294, %s2710_s20   ;;  %s2710_s20 = sphi %s2749_s20, %s17_s20   ;;  %s2706_s19 = sphi %s2747_s19, %s3191_s19   ;;  %s2702_s18 = sphi %s2745_s18, %s3190_s18   ;;  %s2698_s17 = sphi %s2743_s17, %s3189_s17   ;;  %s2694_s16 = sphi %s2741_s16, %s3188_s16   ;;  %s2690_s15 = sphi %s2739_s15, %s3187_s15  }
   0x5   : > { %s36_s23 = sadd.s32 1, %s2706_s19  ;;  %s153_s24 = sadd.s32 1, %s2698_s17 }
   0x6   : > { %p38_p0 = scmp.ge.s32.totalorder %s36_s23, 4  ;;  %p163_p1 = scmp.ne.s32.totalorder %s2698_s17, %s2694_s16 }
   0x7   : > { %p164_p2 = scmp.eq.s32.totalorder %s1945_s21, 3  ;;  %p169_p3 = scmp.ne.s32.totalorder %s2694_s16, %s2690_s15 }
   0x8   : > { %s3193_s23 = smov (%p38_p0, %s36_s23), 0  ;;  %p170_p5 = scmp.eq.s32.totalorder %s1946_s22, 3 }
   0x9   : > { %p2779_p4 = por %p164_p2, %p163_p1  ;;  %s148_s26 = ssub.s32 %s2706_s19, %s3193_s23 }
   0xa   : > { %p1952_p6 = scmp.ge.s32.totalorder %s2710_s20, 1  ;;  %p151_p7 = scmp.eq.s32.totalorder %s148_s26, 0 }
   0xb   : > { %p2786_p8 = por %p170_p5, %p169_p3  ;;  %p227_p9 = scmp.lt.s32.totalorder %s2710_s20, 5 }
   0xc   : > { %s2792_s28 = scalar_select %p151_p7, %s2698_s17, %s153_s24  }
   0xd   : > { %p228_p10 = pnand %p1952_p6, %p227_p9 }
   0xe   : > { %s1954_s21 = sshll.u32 (!%p228_p10), %s2702_s18, 6  ;;  %s2363_s29 = sshll.u32 (!%p228_p10), %s2702_s18, 8 }
   0xf   : > { %231 = sbr.rel (%p228_p10) target bundleno = 447 (0x1bf), region = 36  ;;  %p274_p11 = scmp.lt.s32.totalorder (!%p228_p10), %s1954_s21, 255 }
  0x10   : > { %s1818_s6 = scalar_lea.hbm (!%p228_p10), %s3184_s4, %s2363_s29  ;;  %s2652_s22 = scalar_lea.hbm (!%p228_p10), %s3184_s4, 1024 }
  0x11   : > { %s1821_s8 = sshll.u32 (!%p228_p10), %s1818_s6, 4  ;;  %s1822_s8 = int_to_ptr.hbm [resolvable:$true] %s1821_s8 }
  0x12   : > { %s2646_s9 = sshra.s32 (!%p228_p10), %s1822_s8, 4  ;;  %s2647_s9 = int_to_ptr.hbm [resolvable:$true] %s2646_s9 }
  0x13   : > { %s2648_s10 = scalar_lea.hbm (!%p228_p10), %s2647_s9, 256  ;;  %p2653_p1 = scmp.lt.s32.totalorder (!%p228_p10), %s2647_s9, %s3184_s4 }
  0x14   : > { %v2354_v0 = vld [vmem:[%s3181_s1 + $0x38] sm:$0xff]  ;;  %v2353_v2 = vld [vmem:[%s3181_s1 + $0x30] sm:$0xff]  ;;  %v2352_v4 = vld [vmem:[%s3181_s1 + $0x28] sm:$0xff]  ;;  %s3195_s21 = smov (!%p274_p11, %s1954_s21), 255  ;;  %p2649_p12 = scmp.ne.s32.totalorder %s2647_s9, %s2648_s10 }
  0x15   : > { %v2362_v1 = vld [vmem:[%s3181_s1 + $0x78] sm:$0xff]  ;;  %944 = vmatpush.bf16.msra.mxu0 %v2354_v0  ;;  %2555 = vmatpush.bf16.msra.mxu2 %v2354_v0  ;;  %v2361_v3 = vld [vmem:[%s3181_s1 + $0x70] sm:$0xff]  ;;  %v2360_v5 = vld [vmem:[%s3181_s1 + $0x68] sm:$0xff]  ;;  %s2282_s12 = sshll.u32 %s3195_s21, 3  ;;  %p2654_p2 = scmp.lt.s32.totalorder %s2652_s22, %s2648_s10 }
  0x16   : > { %1113 = vmatpush.bf16.msra.mxu1 %v2362_v1  ;;  %2563 = vmatpush.bf16.msra.mxu3 %v2362_v1  ;;  %v2351_v6 = vld [vmem:[%s3181_s1 + $0x20] sm:$0xff]  ;;  %v2350_v8 = vld [vmem:[%s3181_s1 + $0x18] sm:$0xff]  ;;  %v2349_v10 = vld [vmem:[%s3181_s1 + $0x10] sm:$0xff]  ;;  %s2837_s26 = scalar_lea.vmem %s3180_s0, %s2282_s12  ;;  %s269_s12 = sand.u32 1, %s2694_s16  }
  0x17   : > { %v2359_v7 = vld [vmem:[%s3181_s1 + $0x60] sm:$0xff]  ;;  %v2358_v9 = vld [vmem:[%s3181_s1 + $0x58] sm:$0xff]  ;;  %v2357_v11 = vld [vmem:[%s3181_s1 + $0x50] sm:$0xff]  ;;  %s1953_s13 = sshll.u32 %s269_s12, 8  ;;  %s1806_s18 = scalar_lea.sflag [#allocation4], %s269_s12 }
  0x18   : > { %v2348_v12 = vld [vmem:[%s3181_s1 + $0x8] sm:$0xff]  ;;  %v2347_v14 = vld [vmem:[%s3181_s1] sm:$0xff]  ;;  %v1967_v28 = vld [vmem:[%s2837_s26 + $0x10] sm:$0xf]  ;;  %s2948_s14 = scalar_lea.vmem [#allocation3], %s1953_s13  ;;  %p2650_p13 = pnand %p2649_p12, %p2779_p4 }
  0x19   : > { %945 = vmatpush.bf16.msra.mxu0 %v2353_v2  ;;  %2556 = vmatpush.bf16.msra.mxu2 %v2353_v2  ;;  %v2356_v13 = vld [vmem:[%s3181_s1 + $0x48] sm:$0xff]  ;;  %v2355_v15 = vld [vmem:[%s3181_s1 + $0x40] sm:$0xff]  ;;  %v2286_v29 = vld [vmem:[%s2837_s26 + $0x14] sm:$0xf0]  ;;  %s1819_s7 = sshll.u32 %s2948_s14, 4  ;;  %p2655_p3 = por %p2654_p2, %p2653_p1  ;;  %s1820_s7 = int_to_ptr.vmem [resolvable:$true] %s1819_s7 }
  0x1a   : > { %1114 = vmatpush.bf16.msra.mxu1 %v2361_v3  ;;  %2564 = vmatpush.bf16.msra.mxu3 %v2361_v3  ;;  %v1959_v16 = vld [vmem:[%s2837_s26] sm:$0xf]  ;;  %v2284_v17 = vld [vmem:[%s2837_s26 + $0x4] sm:$0xf0]  ;;  %v2283_v20 = vld [vmem:[%s2837_s26 + $0x4] sm:$0xf]  ;;  %v1968_v36 = vor.u32 %v2286_v29, %v1967_v28  ;;  %p2651_p0 = pneg %p2650_p13 }
  0x1b   : > { %v2087_v18 = vld [vmem:[%s2837_s26 + $0x100] sm:$0xf]  ;;  %v2316_v19 = vld [vmem:[%s2837_s26 + $0x104] sm:$0xf0]  ;;  %v1961_v21 = vld [vmem:[%s2837_s26 + $0x8] sm:$0xf0]  ;;  %v1960_v24 = vor.u32 %v2284_v17, %v1959_v16 }
  0x1c   : > { %v2315_v22 = vld [vmem:[%s2837_s26 + $0x104] sm:$0xf]  ;;  %v2089_v23 = vld [vmem:[%s2837_s26 + $0x108] sm:$0xf0]  ;;  %v2088_v25 = vor.u32 %v2316_v19, %v2087_v18  ;;  %v1964_v26 = vor.u32 %v2283_v20, %v1961_v21  ;;  %v2095_v30 = vld [vmem:[%s2837_s26 + $0x110] sm:$0xf]  ;;  %p2656_p5 = pnand %p2655_p3, %p2651_p0 }
  0x1d   : > { %946 = vmatpush.bf16.msra.mxu0 %v2352_v4  ;;  %2557 = vmatpush.bf16.msra.mxu2 %v2352_v4  ;;  %v2092_v27 = vor.u32 %v2315_v22, %v2089_v23  ;;  %v2318_v31 = vld [vmem:[%s2837_s26 + $0x114] sm:$0xf0]  ;;  %v2285_v32 = vld [vmem:[%s2837_s26 + $0x14] sm:$0xf]  ;;  %v1969_v33 = vld [vmem:[%s2837_s26 + $0x18] sm:$0xf0] }
  0x1e   : > { %1115 = vmatpush.bf16.msra.mxu1 %v2360_v5  ;;  %2565 = vmatpush.bf16.msra.mxu3 %v2360_v5  ;;  %v2317_v34 = vld [vmem:[%s2837_s26 + $0x114] sm:$0xf]  ;;  %v2097_v35 = vld [vmem:[%s2837_s26 + $0x118] sm:$0xf0]  ;;  %v2096_v37 = vor.u32 %v2318_v31, %v2095_v30  ;;  %v1972_v38 = vor.u32 %v2285_v32, %v1969_v33  ;;  %v1975_v40 = vld [vmem:[%s2837_s26 + $0x20] sm:$0xf] }
  0x1f   : > { %v2100_v39 = vor.u32 %v2317_v34, %v2097_v35  ;;  %v2288_v41 = vld [vmem:[%s2837_s26 + $0x24] sm:$0xf0]  ;;  %v2103_v42 = vld [vmem:[%s2837_s26 + $0x120] sm:$0xf]  ;;  %v2287_v44 = vld [vmem:[%s2837_s26 + $0x24] sm:$0xf] }
  0x20   : > { %v2320_v43 = vld [vmem:[%s2837_s26 + $0x124] sm:$0xf0]  ;;  %v1977_v45 = vld [vmem:[%s2837_s26 + $0x28] sm:$0xf0]  ;;  %v2319_v46 = vld [vmem:[%s2837_s26 + $0x124] sm:$0xf]  ;;  %v1976_v48 = vor.u32 %v2288_v41, %v1975_v40 }
  0x21   : > { %947 = vmatpush.bf16.msra.mxu0 %v2351_v6  ;;  %2558 = vmatpush.bf16.msra.mxu2 %v2351_v6  ;;  %v2105_v47 = vld [vmem:[%s2837_s26 + $0x128] sm:$0xf0]  ;;  %v2104_v49 = vor.u32 %v2320_v43, %v2103_v42  ;;  %v1980_v50 = vor.u32 %v2287_v44, %v1977_v45  ;;  %v1983_v52 = vld [vmem:[%s2837_s26 + $0x30] sm:$0xf]  ;;  %v2290_v53 = vld [vmem:[%s2837_s26 + $0x34] sm:$0xf0] }
  0x22   : > { %1116 = vmatpush.bf16.msra.mxu1 %v2359_v7  ;;  %2566 = vmatpush.bf16.msra.mxu3 %v2359_v7  ;;  %v2108_v51 = vor.u32 %v2319_v46, %v2105_v47  ;;  %v2111_v54 = vld [vmem:[%s2837_s26 + $0x130] sm:$0xf]  ;;  %v2322_v55 = vld [vmem:[%s2837_s26 + $0x134] sm:$0xf0]  ;;  %v2289_v56 = vld [vmem:[%s2837_s26 + $0x34] sm:$0xf]  ;;  %v1984_v60 = vor.u32 %v2290_v53, %v1983_v52 }
  0x23   : > { %v1985_v57 = vld [vmem:[%s2837_s26 + $0x38] sm:$0xf0]  ;;  %v2321_v58 = vld [vmem:[%s2837_s26 + $0x134] sm:$0xf]  ;;  %v2112_v61 = vor.u32 %v2322_v55, %v2111_v54  ;;  %v1991_v0 = vld [vmem:[%s2837_s26 + $0x40] sm:$0xf] }
  0x24   : > { %v2113_v59 = vld [vmem:[%s2837_s26 + $0x138] sm:$0xf0]  ;;  %v1988_v62 = vor.u32 %v2289_v56, %v1985_v57  ;;  %v2292_v1 = vld [vmem:[%s2837_s26 + $0x44] sm:$0xf0]  ;;  %v2119_v2 = vld [vmem:[%s2837_s26 + $0x140] sm:$0xf] }
  0x25   : > { %948 = vmatpush.bf16.msra.mxu0 %v2350_v8  ;;  %2559 = vmatpush.bf16.msra.mxu2 %v2350_v8  ;;  %v2116_v63 = vor.u32 %v2321_v58, %v2113_v59  ;;  %v2324_v3 = vld [vmem:[%s2837_s26 + $0x144] sm:$0xf0]  ;;  %v2291_v4 = vld [vmem:[%s2837_s26 + $0x44] sm:$0xf]  ;;  %v1993_v5 = vld [vmem:[%s2837_s26 + $0x48] sm:$0xf0]  ;;  %v1992_v8 = vor.u32 %v2292_v1, %v1991_v0 }
  0x26   : > { %1117 = vmatpush.bf16.msra.mxu1 %v2358_v9  ;;  %2567 = vmatpush.bf16.msra.mxu3 %v2358_v9  ;;  %v2323_v6 = vld [vmem:[%s2837_s26 + $0x144] sm:$0xf]  ;;  %v2121_v7 = vld [vmem:[%s2837_s26 + $0x148] sm:$0xf0]  ;;  %v2120_v9 = vor.u32 %v2324_v3, %v2119_v2  ;;  %v2293_v16 = vld [vmem:[%s2837_s26 + $0x54] sm:$0xf] }
  0x27   : > { %v2001_v17 = vld [vmem:[%s2837_s26 + $0x58] sm:$0xf0]  ;;  %v2325_v18 = vld [vmem:[%s2837_s26 + $0x154] sm:$0xf]  ;;  %v2295_v28 = vld [vmem:[%s2837_s26 + $0x64] sm:$0xf] }
  0x28   : > { %v2129_v19 = vld [vmem:[%s2837_s26 + $0x158] sm:$0xf0]  ;;  %v2004_v22 = vor.u32 %v2293_v16, %v2001_v17  ;;  %v2009_v29 = vld [vmem:[%s2837_s26 + $0x68] sm:$0xf0]  ;;  %v2327_v30 = vld [vmem:[%s2837_s26 + $0x164] sm:$0xf] }
  0x29   : > { %949 = vmatpush.bf16.msra.mxu0 %v2349_v10  ;;  %2560 = vmatpush.bf16.msra.mxu2 %v2349_v10  ;;  %v1996_v10 = vor.u32 %v2291_v4, %v1993_v5  ;;  %v2132_v23 = vor.u32 %v2325_v18, %v2129_v19  ;;  %v2137_v31 = vld [vmem:[%s2837_s26 + $0x168] sm:$0xf0]  ;;  %v2012_v34 = vor.u32 %v2295_v28, %v2009_v29  ;;  %v2297_v40 = vld [vmem:[%s2837_s26 + $0x74] sm:$0xf]  ;;  %v2017_v41 = vld [vmem:[%s2837_s26 + $0x78] sm:$0xf0] }
  0x2a   : > { %1118 = vmatpush.bf16.msra.mxu1 %v2357_v11  ;;  %2568 = vmatpush.bf16.msra.mxu3 %v2357_v11  ;;  %v2124_v11 = vor.u32 %v2323_v6, %v2121_v7  ;;  %v2140_v35 = vor.u32 %v2327_v30, %v2137_v31  ;;  %v2329_v42 = vld [vmem:[%s2837_s26 + $0x174] sm:$0xf]  ;;  %v2145_v43 = vld [vmem:[%s2837_s26 + $0x178] sm:$0xf0]  ;;  %v2020_v46 = vor.u32 %v2297_v40, %v2017_v41  ;;  %v2299_v52 = vld [vmem:[%s2837_s26 + $0x84] sm:$0xf] }
  0x2b   : > { %v2148_v47 = vor.u32 %v2329_v42, %v2145_v43  ;;  %v2025_v53 = vld [vmem:[%s2837_s26 + $0x88] sm:$0xf0]  ;;  %v2331_v54 = vld [vmem:[%s2837_s26 + $0x184] sm:$0xf]  ;;  %v2929_v3 = vld [vmem:[%s3183_s3] ss:$0 sm:$0xff] }
  0x2c   : > { %v2153_v55 = vld [vmem:[%s2837_s26 + $0x188] sm:$0xf0]  ;;  %v2028_v59 = vor.u32 %v2299_v52, %v2025_v53  ;;  %v2333_v16 = vld [vmem:[%s2837_s26 + $0x194] sm:$0xf]  ;;  %v2161_v17 = vld [vmem:[%s2837_s26 + $0x198] sm:$0xf0] }
  0x2d   : > { %950 = vmatpush.bf16.msra.mxu0 %v2348_v12  ;;  %2561 = vmatpush.bf16.msra.mxu2 %v2348_v12  ;;  %v1999_v12 = vld [vmem:[%s2837_s26 + $0x50] sm:$0xf]  ;;  %v2164_v29 = vor.u32 %v2333_v16, %v2161_v17  ;;  %v2303_v52 = vld [vmem:[%s2837_s26 + $0xa4] sm:$0xf]  ;;  %v2041_v53 = vld [vmem:[%s2837_s26 + $0xa8] sm:$0xf0] }
  0x2e   : > { %1119 = vmatpush.bf16.msra.mxu1 %v2356_v13  ;;  %2569 = vmatpush.bf16.msra.mxu3 %v2356_v13  ;;  %v2294_v13 = vld [vmem:[%s2837_s26 + $0x54] sm:$0xf0] }
  0x2f   : > { %v2000_v20 = vor.u32 %v2294_v13, %v1999_v12  ;;  %v2334_v13 = vld [vmem:[%s2837_s26 + $0x194] sm:$0xf0] }
  0x31   : > { %951 = vmatpush.bf16.msra.mxu0 %v2347_v14  ;;  %2562 = vmatpush.bf16.msra.mxu2 %v2347_v14  ;;  %v2127_v14 = vld [vmem:[%s2837_s26 + $0x150] sm:$0xf] }
  0x32   : > { %1120 = vmatpush.bf16.msra.mxu1 %v2355_v15  ;;  %2570 = vmatpush.bf16.msra.mxu3 %v2355_v15  ;;  %v2326_v15 = vld [vmem:[%s2837_s26 + $0x154] sm:$0xf0] }
  0x33   : > { %v2128_v21 = vor.u32 %v2326_v15, %v2127_v14  ;;  %v2301_v14 = vld [vmem:[%s2837_s26 + $0x94] sm:$0xf]  ;;  %v2033_v15 = vld [vmem:[%s2837_s26 + $0x98] sm:$0xf0] }
  0x34   : > { %952 = vmatmul.bf16.vlgmr.msra.gmra.mxu0 %v1960_v24  ;;  %1032 = vmatmul.bf16.vlgmr.msra.gmra.mxu2 %v2088_v25  ;;  %v2007_v24 = vld [vmem:[%s2837_s26 + $0x60] sm:$0xf]  ;;  %v2296_v25 = vld [vmem:[%s2837_s26 + $0x64] sm:$0xf0] }
  0x35   : > { %1121 = vmatmul.bf16.vlgmr.msra.gmra.mxu1 %v1964_v26  ;;  %1201 = vmatmul.bf16.vlgmr.msra.gmra.mxu3 %v2092_v27  ;;  %v2135_v26 = vld [vmem:[%s2837_s26 + $0x160] sm:$0xf]  ;;  %v2328_v27 = vld [vmem:[%s2837_s26 + $0x164] sm:$0xf0]  ;;  %v2008_v32 = vor.u32 %v2296_v25, %v2007_v24  ;;  %v2036_v24 = vor.u32 %v2301_v14, %v2033_v15 }
  0x36   : > { %v2136_v33 = vor.u32 %v2328_v27, %v2135_v26 }
  0x44   : > { %957 = vmatmul.bf16.gmra.mxu0 %v1968_v36  ;;  %1037 = vmatmul.bf16.gmra.mxu2 %v2096_v37  ;;  %v2015_v36 = vld [vmem:[%s2837_s26 + $0x70] sm:$0xf]  ;;  %v2298_v37 = vld [vmem:[%s2837_s26 + $0x74] sm:$0xf0] }
  0x45   : > { %1126 = vmatmul.bf16.gmra.mxu1 %v1972_v38  ;;  %1206 = vmatmul.bf16.gmra.mxu3 %v2100_v39  ;;  %v2143_v38 = vld [vmem:[%s2837_s26 + $0x170] sm:$0xf]  ;;  %v2330_v39 = vld [vmem:[%s2837_s26 + $0x174] sm:$0xf0]  ;;  %v2016_v44 = vor.u32 %v2298_v37, %v2015_v36 }
  0x46   : > { %v2144_v45 = vor.u32 %v2330_v39, %v2143_v38 }
  0x54   : > { %962 = vmatmul.bf16.gmra.mxu0 %v1976_v48  ;;  %1042 = vmatmul.bf16.gmra.mxu2 %v2104_v49  ;;  %v2023_v48 = vld [vmem:[%s2837_s26 + $0x80] sm:$0xf]  ;;  %v2300_v49 = vld [vmem:[%s2837_s26 + $0x84] sm:$0xf0] }
  0x55   : > { %1131 = vmatmul.bf16.gmra.mxu1 %v1980_v50  ;;  %1211 = vmatmul.bf16.gmra.mxu3 %v2108_v51  ;;  %v2151_v50 = vld [vmem:[%s2837_s26 + $0x180] sm:$0xf]  ;;  %v2332_v51 = vld [vmem:[%s2837_s26 + $0x184] sm:$0xf0]  ;;  %v2024_v56 = vor.u32 %v2300_v49, %v2023_v48 }
  0x56   : > { %v2152_v57 = vor.u32 %v2332_v51, %v2151_v50  ;;  %v2167_v48 = vld [vmem:[%s2837_s26 + $0x1a0] sm:$0xf]  ;;  %v2336_v51 = vld [vmem:[%s2837_s26 + $0x1a4] sm:$0xf0] }
  0x64   : > { %967 = vmatmul.bf16.gmra.mxu0 %v1984_v60  ;;  %1047 = vmatmul.bf16.gmra.mxu2 %v2112_v61  ;;  %v2156_v60 = vor.u32 %v2331_v54, %v2153_v55  ;;  %v2335_v54 = vld [vmem:[%s2837_s26 + $0x1a4] sm:$0xf]  ;;  %v2169_v55 = vld [vmem:[%s2837_s26 + $0x1a8] sm:$0xf0] }
  0x65   : > { %1136 = vmatmul.bf16.gmra.mxu1 %v1988_v62  ;;  %1216 = vmatmul.bf16.gmra.mxu3 %v2116_v63  ;;  %v2923_v63 = vld [vmem:[%s3182_s2] ss:$0 sm:$0xff] }
  0x74   : > { %972 = vmatmul.bf16.gmra.mxu0 %v1992_v8  ;;  %1052 = vmatmul.bf16.gmra.mxu2 %v2120_v9  ;;  %v2031_v8 = vld [vmem:[%s2837_s26 + $0x90] sm:$0xf]  ;;  %v2302_v9 = vld [vmem:[%s2837_s26 + $0x94] sm:$0xf0] }
  0x75   : > { %1141 = vmatmul.bf16.gmra.mxu1 %v1996_v10  ;;  %1221 = vmatmul.bf16.gmra.mxu3 %v2124_v11  ;;  %v2159_v10 = vld [vmem:[%s2837_s26 + $0x190] sm:$0xf] }
  0x84   : > { %977 = vmatmul.bf16.gmra.mxu0 %v2000_v20  ;;  %1057 = vmatmul.bf16.gmra.mxu2 %v2128_v21 }
  0x85   : > { %1146 = vmatmul.bf16.gmra.mxu1 %v2004_v22  ;;  %1226 = vmatmul.bf16.gmra.mxu3 %v2132_v23  ;;  %v2032_v22 = vor.u32 %v2302_v9, %v2031_v8  ;;  %v2160_v23 = vor.u32 %v2334_v13, %v2159_v10 }
  0x94   : > { %982 = vmatmul.bf16.gmra.mxu0 %v2008_v32  ;;  %1062 = vmatmul.bf16.gmra.mxu2 %v2136_v33 }
  0x95   : > { %1151 = vmatmul.bf16.gmra.mxu1 %v2012_v34  ;;  %1231 = vmatmul.bf16.gmra.mxu3 %v2140_v35 }
  0xa4   : > { %987 = vmatmul.bf16.gmra.mxu0 %v2016_v44  ;;  %1067 = vmatmul.bf16.gmra.mxu2 %v2144_v45 }
  0xa5   : > { %1156 = vmatmul.bf16.gmra.mxu1 %v2020_v46  ;;  %1236 = vmatmul.bf16.gmra.mxu3 %v2148_v47  ;;  %v2039_v46 = vld [vmem:[%s2837_s26 + $0xa0] sm:$0xf]  ;;  %v2304_v47 = vld [vmem:[%s2837_s26 + $0xa4] sm:$0xf0] }
  0xb1   : > { %v953_v58 = vpop.f32.mrf.mxu0 }
  0xb2   : > { %v1122_v61 = vpop.f32.mrf.mxu1 }
  0xb3   : > { %v1123_v62 = vadd.f32 %v1122_v61, %v953_v58  ;;  %v2168_v61 = vor.u32 %v2336_v51, %v2167_v48 }
  0xb4   : > { %992 = vmatmul.bf16.gmra.mxu0 %v2024_v56  ;;  %1072 = vmatmul.bf16.gmra.mxu2 %v2152_v57 }
  0xb5   : > { %1161 = vmatmul.bf16.gmra.mxu1 %v2028_v59  ;;  %1241 = vmatmul.bf16.gmra.mxu3 %v2156_v60  ;;  %v1481_v2 = vmul.f32 %v2923_v63, %v1123_v62  ;;  %v2040_v60 = vor.u32 %v2304_v47, %v2039_v46  ;;  %v2044_v62 = vor.u32 %v2303_v52, %v2041_v53 }
  0xb7   : > { %v1033_v0 = vpop.f32.mrf.mxu2  ;;  %v1549_v11 = vadd.f32 %v2929_v3, %v1481_v2 }
  0xb8   : > { %v1202_v1 = vpop.f32.mrf.mxu3 }
  0xb9   : > { %v955_v4 = vpop.f32.mrf.mxu0  ;;  %v1203_v6 = vadd.f32 %v1202_v1, %v1033_v0  ;;  %v1613_v25 = vmax.f32 %v1549_v11, 0.0 }
  0xba   : > { %v1124_v5 = vpop.f32.mrf.mxu1 }
  0xbb   : > { %v1125_v7 = vadd.f32 %v1124_v5, %v955_v4  ;;  %v1513_v18 = vmul.f32 %v2923_v63, %v1203_v6  ;;  %v2172_v5 = vor.u32 %v2335_v54, %v2169_v55 }
  0xbd   : > { %v1482_v12 = vmul.f32 %v2923_v63, %v1125_v7  ;;  %v1581_v31 = vadd.f32 %v2929_v3, %v1513_v18 }
  0xbf   : > { %v1550_v19 = vadd.f32 %v2929_v3, %v1482_v12  ;;  %v1035_v20 = vpop.f32.mrf.mxu2  ;;  %v1645_v36 = vmax.f32 %v1581_v31, 0.0  ;;  %v2177_v31 = vld [vmem:[%s2837_s26 + $0x1b8] sm:$0xf0] }
  0xc0   : > { %v1204_v21 = vpop.f32.mrf.mxu3 }
  0xc1   : > { %v1614_v26 = vmax.f32 %v1550_v19, 0.0  ;;  %v1205_v27 = vadd.f32 %v1204_v21, %v1035_v20  ;;  %v958_v28 = vpop.f32.mrf.mxu0 }
  0xc2   : > { %v1127_v30 = vpop.f32.mrf.mxu1 }
  0xc3   : > { %v2367_v32 = vpack.c.bf16 %v1614_v26, %v1613_v25  ;;  %v1514_v33 = vmul.f32 %v2923_v63, %v1205_v27  ;;  %v1128_v35 = vadd.f32 %v1127_v30, %v958_v28  ;;  %v2338_v27 = vld [vmem:[%s2837_s26 + $0x1b4] sm:$0xf0]  ;;  %v2305_v28 = vld [vmem:[%s2837_s26 + $0xb4] sm:$0xf] }
  0xc4   : > { %997 = vmatmul.bf16.gmra.mxu0 %v2032_v22  ;;  %1077 = vmatmul.bf16.gmra.mxu2 %v2160_v23  ;;  %v2047_v22 = vld [vmem:[%s2837_s26 + $0xb0] sm:$0xf]  ;;  %v2306_v23 = vld [vmem:[%s2837_s26 + $0xb4] sm:$0xf0]  ;;  %v2337_v30 = vld [vmem:[%s2837_s26 + $0x1b4] sm:$0xf] }
  0xc5   : > { %2368 = vst [vmem:[%s2948_s14] sm:$0xff] %v2367_v32   ;;  %v1582_v34 = vadd.f32 %v2929_v3, %v1514_v33  ;;  %1166 = vmatmul.bf16.gmra.mxu1 %v2036_v24  ;;  %1246 = vmatmul.bf16.gmra.mxu3 %v2164_v29  ;;  %v1483_v41 = vmul.f32 %v2923_v63, %v1128_v35  ;;  %v2175_v24 = vld [vmem:[%s2837_s26 + $0x1b0] sm:$0xf]  ;;  %v2049_v29 = vld [vmem:[%s2837_s26 + $0xb8] sm:$0xf0] }
  0xc7   : > { %v1646_v37 = vmax.f32 %v1582_v34, 0.0  ;;  %v1038_v38 = vpop.f32.mrf.mxu2  ;;  %v1551_v49 = vadd.f32 %v2929_v3, %v1483_v41 }
  0xc8   : > { %v1207_v39 = vpop.f32.mrf.mxu3 }
  0xc9   : > { %v2447_v40 = vpack.c.bf16 %v1646_v37, %v1645_v36  ;;  %v960_v42 = vpop.f32.mrf.mxu0  ;;  %v1208_v44 = vadd.f32 %v1207_v39, %v1038_v38  ;;  %v1615_v0 = vmax.f32 %v1551_v49, 0.0  ;;  %v2048_v36 = vor.u32 %v2306_v23, %v2047_v22 }
  0xca   : > { %v1129_v43 = vpop.f32.mrf.mxu1  ;;  %v2176_v37 = vor.u32 %v2338_v27, %v2175_v24  ;;  %v2052_v38 = vor.u32 %v2305_v28, %v2049_v29 }
  0xcb   : > { %2539 = vst [vmem:[%s2948_s14 + $0x80] sm:$0xff] %v2447_v40   ;;  %v1130_v45 = vadd.f32 %v1129_v43, %v960_v42  ;;  %v1515_v56 = vmul.f32 %v2923_v63, %v1208_v44  ;;  %v2180_v43 = vor.u32 %v2337_v30, %v2177_v31 }
  0xcd   : > { %v1484_v50 = vmul.f32 %v2923_v63, %v1130_v45  ;;  %v1583_v7 = vadd.f32 %v2929_v3, %v1515_v56 }
  0xcf   : > { %v1552_v57 = vadd.f32 %v2929_v3, %v1484_v50  ;;  %v1040_v58 = vpop.f32.mrf.mxu2  ;;  %v1647_v12 = vmax.f32 %v1583_v7, 0.0  ;;  %v2185_v7 = vld [vmem:[%s2837_s26 + $0x1c8] sm:$0xf0] }
  0xd0   : > { %v1209_v59 = vpop.f32.mrf.mxu3 }
  0xd1   : > { %v1616_v1 = vmax.f32 %v1552_v57, 0.0  ;;  %v1210_v2 = vadd.f32 %v1209_v59, %v1040_v58  ;;  %v963_v4 = vpop.f32.mrf.mxu0 }
  0xd2   : > { %v1132_v6 = vpop.f32.mrf.mxu1 }
  0xd3   : > { %v2372_v8 = vpack.c.bf16 %v1616_v1, %v1615_v0  ;;  %v1516_v9 = vmul.f32 %v2923_v63, %v1210_v2  ;;  %v1133_v11 = vadd.f32 %v1132_v6, %v963_v4  ;;  %v2340_v2 = vld [vmem:[%s2837_s26 + $0x1c4] sm:$0xf0]  ;;  %v2307_v4 = vld [vmem:[%s2837_s26 + $0xc4] sm:$0xf] }
  0xd4   : > { %1002 = vmatmul.bf16.gmra.mxu0 %v2040_v60  ;;  %1082 = vmatmul.bf16.gmra.mxu2 %v2168_v61  ;;  %v2055_v60 = vld [vmem:[%s2837_s26 + $0xc0] sm:$0xf]  ;;  %v2308_v61 = vld [vmem:[%s2837_s26 + $0xc4] sm:$0xf0]  ;;  %v2339_v6 = vld [vmem:[%s2837_s26 + $0x1c4] sm:$0xf] }
  0xd5   : > { %2524 = vst [vmem:[%s2948_s14 + $0x8] sm:$0xff] %v2372_v8   ;;  %v1584_v10 = vadd.f32 %v2929_v3, %v1516_v9  ;;  %1171 = vmatmul.bf16.gmra.mxu1 %v2044_v62  ;;  %1251 = vmatmul.bf16.gmra.mxu3 %v2172_v5  ;;  %v1485_v17 = vmul.f32 %v2923_v63, %v1133_v11  ;;  %v2183_v62 = vld [vmem:[%s2837_s26 + $0x1c0] sm:$0xf]  ;;  %v2057_v5 = vld [vmem:[%s2837_s26 + $0xc8] sm:$0xf0] }
  0xd7   : > { %v1648_v13 = vmax.f32 %v1584_v10, 0.0  ;;  %v1043_v14 = vpop.f32.mrf.mxu2  ;;  %v1553_v25 = vadd.f32 %v2929_v3, %v1485_v17 }
  0xd8   : > { %v1212_v15 = vpop.f32.mrf.mxu3 }
  0xd9   : > { %v2452_v16 = vpack.c.bf16 %v1648_v13, %v1647_v12  ;;  %v965_v18 = vpop.f32.mrf.mxu0  ;;  %v1213_v20 = vadd.f32 %v1212_v15, %v1043_v14  ;;  %v1617_v39 = vmax.f32 %v1553_v25, 0.0  ;;  %v2056_v12 = vor.u32 %v2308_v61, %v2055_v60 }
  0xda   : > { %v1134_v19 = vpop.f32.mrf.mxu1  ;;  %v2184_v13 = vor.u32 %v2340_v2, %v2183_v62  ;;  %v2060_v14 = vor.u32 %v2307_v4, %v2057_v5 }
  0xdb   : > { %2540 = vst [vmem:[%s2948_s14 + $0x88] sm:$0xff] %v2452_v16   ;;  %v1135_v21 = vadd.f32 %v1134_v19, %v965_v18  ;;  %v1517_v32 = vmul.f32 %v2923_v63, %v1213_v20  ;;  %v2188_v19 = vor.u32 %v2339_v6, %v2185_v7 }
  0xdd   : > { %v1486_v26 = vmul.f32 %v2923_v63, %v1135_v21  ;;  %v1585_v45 = vadd.f32 %v2929_v3, %v1517_v32 }
  0xdf   : > { %v1554_v33 = vadd.f32 %v2929_v3, %v1486_v26  ;;  %v1045_v34 = vpop.f32.mrf.mxu2  ;;  %v1649_v50 = vmax.f32 %v1585_v45, 0.0  ;;  %v2193_v45 = vld [vmem:[%s2837_s26 + $0x1d8] sm:$0xf0] }
  0xe0   : > { %v1214_v35 = vpop.f32.mrf.mxu3 }
  0xe1   : > { %v1618_v40 = vmax.f32 %v1554_v33, 0.0  ;;  %v1215_v41 = vadd.f32 %v1214_v35, %v1045_v34  ;;  %v968_v42 = vpop.f32.mrf.mxu0 }
  0xe2   : > { %v1137_v44 = vpop.f32.mrf.mxu1 }
  0xe3   : > { %v2377_v46 = vpack.c.bf16 %v1618_v40, %v1617_v39  ;;  %v1518_v47 = vmul.f32 %v2923_v63, %v1215_v41  ;;  %v1138_v49 = vadd.f32 %v1137_v44, %v968_v42  ;;  %v2342_v41 = vld [vmem:[%s2837_s26 + $0x1d4] sm:$0xf0]  ;;  %v2309_v42 = vld [vmem:[%s2837_s26 + $0xd4] sm:$0xf] }
  0xe4   : > { %1007 = vmatmul.bf16.gmra.mxu0 %v2048_v36  ;;  %1087 = vmatmul.bf16.gmra.mxu2 %v2176_v37  ;;  %v2063_v36 = vld [vmem:[%s2837_s26 + $0xd0] sm:$0xf]  ;;  %v2310_v37 = vld [vmem:[%s2837_s26 + $0xd4] sm:$0xf0]  ;;  %v2341_v44 = vld [vmem:[%s2837_s26 + $0x1d4] sm:$0xf] }
  0xe5   : > { %2525 = vst [vmem:[%s2948_s14 + $0x10] sm:$0xff] %v2377_v46   ;;  %v1586_v48 = vadd.f32 %v2929_v3, %v1518_v47  ;;  %1176 = vmatmul.bf16.gmra.mxu1 %v2052_v38  ;;  %1256 = vmatmul.bf16.gmra.mxu3 %v2180_v43  ;;  %v1487_v55 = vmul.f32 %v2923_v63, %v1138_v49  ;;  %v2191_v38 = vld [vmem:[%s2837_s26 + $0x1d0] sm:$0xf]  ;;  %v2065_v43 = vld [vmem:[%s2837_s26 + $0xd8] sm:$0xf0] }
  0xe7   : > { %v1650_v51 = vmax.f32 %v1586_v48, 0.0  ;;  %v1048_v52 = vpop.f32.mrf.mxu2  ;;  %v1555_v0 = vadd.f32 %v2929_v3, %v1487_v55 }
  0xe8   : > { %v1217_v53 = vpop.f32.mrf.mxu3 }
  0xe9   : > { %v2457_v54 = vpack.c.bf16 %v1650_v51, %v1649_v50  ;;  %v970_v56 = vpop.f32.mrf.mxu0  ;;  %v1218_v58 = vadd.f32 %v1217_v53, %v1048_v52  ;;  %v1619_v15 = vmax.f32 %v1555_v0, 0.0  ;;  %v2064_v50 = vor.u32 %v2310_v37, %v2063_v36 }
  0xea   : > { %v1139_v57 = vpop.f32.mrf.mxu1  ;;  %v2192_v51 = vor.u32 %v2342_v41, %v2191_v38  ;;  %v2068_v52 = vor.u32 %v2309_v42, %v2065_v43 }
  0xeb   : > { %2541 = vst [vmem:[%s2948_s14 + $0x90] sm:$0xff] %v2457_v54   ;;  %v1140_v59 = vadd.f32 %v1139_v57, %v970_v56  ;;  %v1519_v8 = vmul.f32 %v2923_v63, %v1218_v58  ;;  %v2196_v57 = vor.u32 %v2341_v44, %v2193_v45 }
  0xed   : > { %v1488_v1 = vmul.f32 %v2923_v63, %v1140_v59  ;;  %v1587_v21 = vadd.f32 %v2929_v3, %v1519_v8 }
  0xef   : > { %v1556_v9 = vadd.f32 %v2929_v3, %v1488_v1  ;;  %v1050_v10 = vpop.f32.mrf.mxu2  ;;  %v1651_v26 = vmax.f32 %v1587_v21, 0.0  ;;  %v2201_v21 = vld [vmem:[%s2837_s26 + $0x1e8] sm:$0xf0] }
  0xf0   : > { %v1219_v11 = vpop.f32.mrf.mxu3 }
  0xf1   : > { %v1620_v16 = vmax.f32 %v1556_v9, 0.0  ;;  %v1220_v17 = vadd.f32 %v1219_v11, %v1050_v10  ;;  %v973_v18 = vpop.f32.mrf.mxu0 }
  0xf2   : > { %v1142_v20 = vpop.f32.mrf.mxu1 }
  0xf3   : > { %v2382_v22 = vpack.c.bf16 %v1620_v16, %v1619_v15  ;;  %v1520_v23 = vmul.f32 %v2923_v63, %v1220_v17  ;;  %v1143_v25 = vadd.f32 %v1142_v20, %v973_v18  ;;  %v2344_v17 = vld [vmem:[%s2837_s26 + $0x1e4] sm:$0xf0]  ;;  %v2311_v18 = vld [vmem:[%s2837_s26 + $0xe4] sm:$0xf] }
  0xf4   : > { %1012 = vmatmul.bf16.gmra.mxu0 %v2056_v12  ;;  %1092 = vmatmul.bf16.gmra.mxu2 %v2184_v13  ;;  %v2071_v12 = vld [vmem:[%s2837_s26 + $0xe0] sm:$0xf]  ;;  %v2312_v13 = vld [vmem:[%s2837_s26 + $0xe4] sm:$0xf0]  ;;  %v2343_v20 = vld [vmem:[%s2837_s26 + $0x1e4] sm:$0xf] }
  0xf5   : > { %2526 = vst [vmem:[%s2948_s14 + $0x18] sm:$0xff] %v2382_v22   ;;  %v1588_v24 = vadd.f32 %v2929_v3, %v1520_v23  ;;  %1181 = vmatmul.bf16.gmra.mxu1 %v2060_v14  ;;  %1261 = vmatmul.bf16.gmra.mxu3 %v2188_v19  ;;  %v1489_v31 = vmul.f32 %v2923_v63, %v1143_v25  ;;  %v2199_v14 = vld [vmem:[%s2837_s26 + $0x1e0] sm:$0xf]  ;;  %v2073_v19 = vld [vmem:[%s2837_s26 + $0xe8] sm:$0xf0] }
  0xf7   : > { %v1652_v27 = vmax.f32 %v1588_v24, 0.0  ;;  %v1053_v28 = vpop.f32.mrf.mxu2  ;;  %v1557_v39 = vadd.f32 %v2929_v3, %v1489_v31 }
  0xf8   : > { %v1222_v29 = vpop.f32.mrf.mxu3 }
  0xf9   : > { %v2462_v30 = vpack.c.bf16 %v1652_v27, %v1651_v26  ;;  %v975_v32 = vpop.f32.mrf.mxu0  ;;  %v1223_v34 = vadd.f32 %v1222_v29, %v1053_v28  ;;  %v1621_v53 = vmax.f32 %v1557_v39, 0.0  ;;  %v2072_v26 = vor.u32 %v2312_v13, %v2071_v12 }
  0xfa   : > { %v1144_v33 = vpop.f32.mrf.mxu1  ;;  %v2200_v27 = vor.u32 %v2344_v17, %v2199_v14  ;;  %v2076_v28 = vor.u32 %v2311_v18, %v2073_v19 }
  0xfb   : > { %2542 = vst [vmem:[%s2948_s14 + $0x98] sm:$0xff] %v2462_v30   ;;  %v1145_v35 = vadd.f32 %v1144_v33, %v975_v32  ;;  %v1521_v46 = vmul.f32 %v2923_v63, %v1223_v34  ;;  %v2204_v33 = vor.u32 %v2343_v20, %v2201_v21 }
  0xfd   : > { %v1490_v40 = vmul.f32 %v2923_v63, %v1145_v35  ;;  %v1589_v59 = vadd.f32 %v2929_v3, %v1521_v46 }
  0xff   : > { %v1558_v47 = vadd.f32 %v2929_v3, %v1490_v40  ;;  %v1055_v48 = vpop.f32.mrf.mxu2  ;;  %v1653_v1 = vmax.f32 %v1589_v59, 0.0  ;;  %v2209_v59 = vld [vmem:[%s2837_s26 + $0x1f8] sm:$0xf0] }
 0x100   : > { %v1224_v49 = vpop.f32.mrf.mxu3 }
 0x101   : > { %v1622_v54 = vmax.f32 %v1558_v47, 0.0  ;;  %v1225_v55 = vadd.f32 %v1224_v49, %v1055_v48  ;;  %v978_v56 = vpop.f32.mrf.mxu0 }
 0x102   : > { %v1147_v58 = vpop.f32.mrf.mxu1 }
 0x103   : > { %v2387_v60 = vpack.c.bf16 %v1622_v54, %v1621_v53  ;;  %v1522_v61 = vmul.f32 %v2923_v63, %v1225_v55  ;;  %v1148_v0 = vadd.f32 %v1147_v58, %v978_v56  ;;  %v2346_v55 = vld [vmem:[%s2837_s26 + $0x1f4] sm:$0xf0]  ;;  %v2313_v56 = vld [vmem:[%s2837_s26 + $0xf4] sm:$0xf] }
 0x104   : > { %1017 = vmatmul.bf16.gmra.mxu0 %v2064_v50  ;;  %1097 = vmatmul.bf16.gmra.mxu2 %v2192_v51  ;;  %v2079_v50 = vld [vmem:[%s2837_s26 + $0xf0] sm:$0xf]  ;;  %v2314_v51 = vld [vmem:[%s2837_s26 + $0xf4] sm:$0xf0]  ;;  %v2345_v58 = vld [vmem:[%s2837_s26 + $0x1f4] sm:$0xf] }
 0x105   : > { %2527 = vst [vmem:[%s2948_s14 + $0x20] sm:$0xff] %v2387_v60   ;;  %v1590_v62 = vadd.f32 %v2929_v3, %v1522_v61  ;;  %1186 = vmatmul.bf16.gmra.mxu1 %v2068_v52  ;;  %1266 = vmatmul.bf16.gmra.mxu3 %v2196_v57  ;;  %v1491_v7 = vmul.f32 %v2923_v63, %v1148_v0  ;;  %v2207_v52 = vld [vmem:[%s2837_s26 + $0x1f0] sm:$0xf]  ;;  %v2081_v57 = vld [vmem:[%s2837_s26 + $0xf8] sm:$0xf0] }
 0x107   : > { %v1654_v2 = vmax.f32 %v1590_v62, 0.0  ;;  %v1058_v4 = vpop.f32.mrf.mxu2  ;;  %v1559_v15 = vadd.f32 %v2929_v3, %v1491_v7 }
 0x108   : > { %v1227_v5 = vpop.f32.mrf.mxu3 }
 0x109   : > { %v2467_v6 = vpack.c.bf16 %v1654_v2, %v1653_v1  ;;  %v980_v8 = vpop.f32.mrf.mxu0  ;;  %v1228_v10 = vadd.f32 %v1227_v5, %v1058_v4  ;;  %v1623_v29 = vmax.f32 %v1559_v15, 0.0  ;;  %v2080_v1 = vor.u32 %v2314_v51, %v2079_v50 }
 0x10a   : > { %v1149_v9 = vpop.f32.mrf.mxu1  ;;  %v2208_v2 = vor.u32 %v2346_v55, %v2207_v52  ;;  %v2084_v4 = vor.u32 %v2313_v56, %v2081_v57 }
 0x10b   : > { %2543 = vst [vmem:[%s2948_s14 + $0xa0] sm:$0xff] %v2467_v6   ;;  %v1150_v11 = vadd.f32 %v1149_v9, %v980_v8  ;;  %v1523_v22 = vmul.f32 %v2923_v63, %v1228_v10  ;;  %v2212_v9 = vor.u32 %v2345_v58, %v2209_v59 }
 0x10d   : > { %v1492_v16 = vmul.f32 %v2923_v63, %v1150_v11  ;;  %v1591_v35 = vadd.f32 %v2929_v3, %v1523_v22 }
 0x10f   : > { %v1560_v23 = vadd.f32 %v2929_v3, %v1492_v16  ;;  %v1060_v24 = vpop.f32.mrf.mxu2  ;;  %v1655_v40 = vmax.f32 %v1591_v35, 0.0 }
 0x110   : > { %v1229_v25 = vpop.f32.mrf.mxu3 }
 0x111   : > { %v1624_v30 = vmax.f32 %v1560_v23, 0.0  ;;  %v1230_v31 = vadd.f32 %v1229_v25, %v1060_v24  ;;  %v983_v32 = vpop.f32.mrf.mxu0 }
 0x112   : > { %v1152_v34 = vpop.f32.mrf.mxu1 }
 0x113   : > { %v2392_v36 = vpack.c.bf16 %v1624_v30, %v1623_v29  ;;  %v1524_v37 = vmul.f32 %v2923_v63, %v1230_v31  ;;  %v1153_v39 = vadd.f32 %v1152_v34, %v983_v32 }
 0x114   : > { %1022 = vmatmul.bf16.gmra.mxu0 %v2072_v26  ;;  %1102 = vmatmul.bf16.gmra.mxu2 %v2200_v27 }
 0x115   : > { %2528 = vst [vmem:[%s2948_s14 + $0x28] sm:$0xff] %v2392_v36   ;;  %v1592_v38 = vadd.f32 %v2929_v3, %v1524_v37  ;;  %1191 = vmatmul.bf16.gmra.mxu1 %v2076_v28  ;;  %1271 = vmatmul.bf16.gmra.mxu3 %v2204_v33  ;;  %v1493_v45 = vmul.f32 %v2923_v63, %v1153_v39 }
 0x117   : > { %v1656_v41 = vmax.f32 %v1592_v38, 0.0  ;;  %v1063_v42 = vpop.f32.mrf.mxu2  ;;  %v1561_v53 = vadd.f32 %v2929_v3, %v1493_v45 }
 0x118   : > { %v1232_v43 = vpop.f32.mrf.mxu3 }
 0x119   : > { %v2472_v44 = vpack.c.bf16 %v1656_v41, %v1655_v40  ;;  %v985_v46 = vpop.f32.mrf.mxu0  ;;  %v1233_v48 = vadd.f32 %v1232_v43, %v1063_v42  ;;  %v1625_v5 = vmax.f32 %v1561_v53, 0.0 }
 0x11a   : > { %v1154_v47 = vpop.f32.mrf.mxu1 }
 0x11b   : > { %2544 = vst [vmem:[%s2948_s14 + $0xa8] sm:$0xff] %v2472_v44   ;;  %v1155_v49 = vadd.f32 %v1154_v47, %v985_v46  ;;  %v1525_v60 = vmul.f32 %v2923_v63, %v1233_v48 }
 0x11d   : > { %v1494_v54 = vmul.f32 %v2923_v63, %v1155_v49  ;;  %v1593_v11 = vadd.f32 %v2929_v3, %v1525_v60 }
 0x11f   : > { %v1562_v61 = vadd.f32 %v2929_v3, %v1494_v54  ;;  %v1065_v62 = vpop.f32.mrf.mxu2  ;;  %v1657_v16 = vmax.f32 %v1593_v11, 0.0 }
 0x120   : > { %v1234_v0 = vpop.f32.mrf.mxu3 }
 0x121   : > { %v1626_v6 = vmax.f32 %v1562_v61, 0.0  ;;  %v1235_v7 = vadd.f32 %v1234_v0, %v1065_v62  ;;  %v988_v8 = vpop.f32.mrf.mxu0 }
 0x122   : > { %v1157_v10 = vpop.f32.mrf.mxu1 }
 0x123   : > { %v2397_v12 = vpack.c.bf16 %v1626_v6, %v1625_v5  ;;  %v1526_v13 = vmul.f32 %v2923_v63, %v1235_v7  ;;  %v1158_v15 = vadd.f32 %v1157_v10, %v988_v8 }
 0x124   : > { %1027 = vmatmul.bf16.gmra.mxu0 %v2080_v1  ;;  %1107 = vmatmul.bf16.gmra.mxu2 %v2208_v2 }
 0x125   : > { %2529 = vst [vmem:[%s2948_s14 + $0x30] sm:$0xff] %v2397_v12   ;;  %v1594_v14 = vadd.f32 %v2929_v3, %v1526_v13  ;;  %1196 = vmatmul.bf16.gmra.mxu1 %v2084_v4  ;;  %1276 = vmatmul.bf16.gmra.mxu3 %v2212_v9  ;;  %v1495_v21 = vmul.f32 %v2923_v63, %v1158_v15 }
 0x127   : > { %v1658_v17 = vmax.f32 %v1594_v14, 0.0  ;;  %v1068_v18 = vpop.f32.mrf.mxu2  ;;  %v1563_v26 = vadd.f32 %v2929_v3, %v1495_v21 }
 0x128   : > { %v1237_v19 = vpop.f32.mrf.mxu3 }
 0x129   : > { %v2477_v20 = vpack.c.bf16 %v1658_v17, %v1657_v16  ;;  %v990_v22 = vpop.f32.mrf.mxu0  ;;  %v1238_v24 = vadd.f32 %v1237_v19, %v1068_v18  ;;  %v1627_v32 = vmax.f32 %v1563_v26, 0.0 }
 0x12a   : > { %v1159_v23 = vpop.f32.mrf.mxu1 }
 0x12b   : > { %2545 = vst [vmem:[%s2948_s14 + $0xb0] sm:$0xff] %v2477_v20   ;;  %v1160_v25 = vadd.f32 %v1159_v23, %v990_v22  ;;  %v1527_v28 = vmul.f32 %v2923_v63, %v1238_v24 }
 0x12d   : > { %v1496_v27 = vmul.f32 %v2923_v63, %v1160_v25  ;;  %v1595_v37 = vadd.f32 %v2929_v3, %v1527_v28 }
 0x12f   : > { %v1564_v29 = vadd.f32 %v2929_v3, %v1496_v27  ;;  %v1070_v30 = vpop.f32.mrf.mxu2  ;;  %v1659_v42 = vmax.f32 %v1595_v37, 0.0 }
 0x130   : > { %v1239_v31 = vpop.f32.mrf.mxu3 }
 0x131   : > { %v1628_v33 = vmax.f32 %v1564_v29, 0.0  ;;  %v1240_v34 = vadd.f32 %v1239_v31, %v1070_v30  ;;  %v993_v35 = vpop.f32.mrf.mxu0 }
 0x132   : > { %v1162_v36 = vpop.f32.mrf.mxu1 }
 0x133   : > { %v2402_v38 = vpack.c.bf16 %v1628_v33, %v1627_v32  ;;  %v1528_v39 = vmul.f32 %v2923_v63, %v1240_v34  ;;  %v1163_v41 = vadd.f32 %v1162_v36, %v993_v35 }
 0x135   : > { %2530 = vst [vmem:[%s2948_s14 + $0x38] sm:$0xff] %v2402_v38   ;;  %v1596_v40 = vadd.f32 %v2929_v3, %v1528_v39  ;;  %v1497_v47 = vmul.f32 %v2923_v63, %v1163_v41 }
 0x137   : > { %v1660_v43 = vmax.f32 %v1596_v40, 0.0  ;;  %v1073_v44 = vpop.f32.mrf.mxu2  ;;  %v1565_v52 = vadd.f32 %v2929_v3, %v1497_v47 }
 0x138   : > { %v1242_v45 = vpop.f32.mrf.mxu3 }
 0x139   : > { %v2482_v46 = vpack.c.bf16 %v1660_v43, %v1659_v42  ;;  %v995_v48 = vpop.f32.mrf.mxu0  ;;  %v1243_v50 = vadd.f32 %v1242_v45, %v1073_v44  ;;  %v1629_v58 = vmax.f32 %v1565_v52, 0.0 }
 0x13a   : > { %v1164_v49 = vpop.f32.mrf.mxu1 }
 0x13b   : > { %2546 = vst [vmem:[%s2948_s14 + $0xb8] sm:$0xff] %v2482_v46   ;;  %v1165_v51 = vadd.f32 %v1164_v49, %v995_v48  ;;  %v1529_v54 = vmul.f32 %v2923_v63, %v1243_v50 }
 0x13d   : > { %v1498_v53 = vmul.f32 %v2923_v63, %v1165_v51  ;;  %v1597_v0 = vadd.f32 %v2929_v3, %v1529_v54 }
 0x13f   : > { %v1566_v55 = vadd.f32 %v2929_v3, %v1498_v53  ;;  %v1075_v56 = vpop.f32.mrf.mxu2  ;;  %v1661_v6 = vmax.f32 %v1597_v0, 0.0 }
 0x140   : > { %v1244_v57 = vpop.f32.mrf.mxu3 }
 0x141   : > { %v1630_v59 = vmax.f32 %v1566_v55, 0.0  ;;  %v1245_v60 = vadd.f32 %v1244_v57, %v1075_v56  ;;  %v998_v61 = vpop.f32.mrf.mxu0 }
 0x142   : > { %v1167_v62 = vpop.f32.mrf.mxu1 }
 0x143   : > { %v2407_v1 = vpack.c.bf16 %v1630_v59, %v1629_v58  ;;  %v1530_v2 = vmul.f32 %v2923_v63, %v1245_v60  ;;  %v1168_v5 = vadd.f32 %v1167_v62, %v998_v61 }
 0x145   : > { %2531 = vst [vmem:[%s2948_s14 + $0x40] sm:$0xff] %v2407_v1   ;;  %v1598_v4 = vadd.f32 %v2929_v3, %v1530_v2  ;;  %v1499_v11 = vmul.f32 %v2923_v63, %v1168_v5 }
 0x147   : > { %v1662_v7 = vmax.f32 %v1598_v4, 0.0  ;;  %v1078_v8 = vpop.f32.mrf.mxu2  ;;  %v1567_v16 = vadd.f32 %v2929_v3, %v1499_v11 }
 0x148   : > { %v1247_v9 = vpop.f32.mrf.mxu3 }
 0x149   : > { %v2487_v10 = vpack.c.bf16 %v1662_v7, %v1661_v6  ;;  %v1000_v12 = vpop.f32.mrf.mxu0  ;;  %v1248_v14 = vadd.f32 %v1247_v9, %v1078_v8  ;;  %v1631_v22 = vmax.f32 %v1567_v16, 0.0 }
 0x14a   : > { %v1169_v13 = vpop.f32.mrf.mxu1 }
 0x14b   : > { %2547 = vst [vmem:[%s2948_s14 + $0xc0] sm:$0xff] %v2487_v10   ;;  %v1170_v15 = vadd.f32 %v1169_v13, %v1000_v12  ;;  %v1531_v18 = vmul.f32 %v2923_v63, %v1248_v14 }
 0x14d   : > { %v1500_v17 = vmul.f32 %v2923_v63, %v1170_v15  ;;  %v1599_v27 = vadd.f32 %v2929_v3, %v1531_v18 }
 0x14f   : > { %v1568_v19 = vadd.f32 %v2929_v3, %v1500_v17  ;;  %v1080_v20 = vpop.f32.mrf.mxu2  ;;  %v1663_v32 = vmax.f32 %v1599_v27, 0.0 }
 0x150   : > { %v1249_v21 = vpop.f32.mrf.mxu3 }
 0x151   : > { %v1632_v23 = vmax.f32 %v1568_v19, 0.0  ;;  %v1250_v24 = vadd.f32 %v1249_v21, %v1080_v20  ;;  %v1003_v25 = vpop.f32.mrf.mxu0 }
 0x152   : > { %v1172_v26 = vpop.f32.mrf.mxu1 }
 0x153   : > { %v2412_v28 = vpack.c.bf16 %v1632_v23, %v1631_v22  ;;  %v1532_v29 = vmul.f32 %v2923_v63, %v1250_v24  ;;  %v1173_v31 = vadd.f32 %v1172_v26, %v1003_v25 }
 0x155   : > { %2532 = vst [vmem:[%s2948_s14 + $0x48] sm:$0xff] %v2412_v28   ;;  %v1600_v30 = vadd.f32 %v2929_v3, %v1532_v29  ;;  %v1501_v37 = vmul.f32 %v2923_v63, %v1173_v31 }
 0x157   : > { %v1664_v33 = vmax.f32 %v1600_v30, 0.0  ;;  %v1083_v34 = vpop.f32.mrf.mxu2  ;;  %v1569_v42 = vadd.f32 %v2929_v3, %v1501_v37 }
 0x158   : > { %v1252_v35 = vpop.f32.mrf.mxu3 }
 0x159   : > { %v2492_v36 = vpack.c.bf16 %v1664_v33, %v1663_v32  ;;  %v1005_v38 = vpop.f32.mrf.mxu0  ;;  %v1253_v40 = vadd.f32 %v1252_v35, %v1083_v34  ;;  %v1633_v48 = vmax.f32 %v1569_v42, 0.0 }
 0x15a   : > { %v1174_v39 = vpop.f32.mrf.mxu1 }
 0x15b   : > { %2548 = vst [vmem:[%s2948_s14 + $0xc8] sm:$0xff] %v2492_v36   ;;  %v1175_v41 = vadd.f32 %v1174_v39, %v1005_v38  ;;  %v1533_v44 = vmul.f32 %v2923_v63, %v1253_v40 }
 0x15d   : > { %v1502_v43 = vmul.f32 %v2923_v63, %v1175_v41  ;;  %v1601_v53 = vadd.f32 %v2929_v3, %v1533_v44 }
 0x15f   : > { %v1570_v45 = vadd.f32 %v2929_v3, %v1502_v43  ;;  %v1085_v46 = vpop.f32.mrf.mxu2  ;;  %v1665_v58 = vmax.f32 %v1601_v53, 0.0 }
 0x160   : > { %v1254_v47 = vpop.f32.mrf.mxu3 }
 0x161   : > { %v1634_v49 = vmax.f32 %v1570_v45, 0.0  ;;  %v1255_v50 = vadd.f32 %v1254_v47, %v1085_v46  ;;  %v1008_v51 = vpop.f32.mrf.mxu0 }
 0x162   : > { %v1177_v52 = vpop.f32.mrf.mxu1 }
 0x163   : > { %v2417_v54 = vpack.c.bf16 %v1634_v49, %v1633_v48  ;;  %v1534_v55 = vmul.f32 %v2923_v63, %v1255_v50  ;;  %v1178_v57 = vadd.f32 %v1177_v52, %v1008_v51 }
 0x165   : > { %2533 = vst [vmem:[%s2948_s14 + $0x50] sm:$0xff] %v2417_v54   ;;  %v1602_v56 = vadd.f32 %v2929_v3, %v1534_v55  ;;  %v1503_v0 = vmul.f32 %v2923_v63, %v1178_v57 }
 0x167   : > { %v1666_v59 = vmax.f32 %v1602_v56, 0.0  ;;  %v1088_v60 = vpop.f32.mrf.mxu2  ;;  %v1571_v6 = vadd.f32 %v2929_v3, %v1503_v0 }
 0x168   : > { %v1257_v61 = vpop.f32.mrf.mxu3 }
 0x169   : > { %v2497_v62 = vpack.c.bf16 %v1666_v59, %v1665_v58  ;;  %v1010_v1 = vpop.f32.mrf.mxu0  ;;  %v1258_v4 = vadd.f32 %v1257_v61, %v1088_v60  ;;  %v1635_v12 = vmax.f32 %v1571_v6, 0.0 }
 0x16a   : > { %v1179_v2 = vpop.f32.mrf.mxu1 }
 0x16b   : > { %2549 = vst [vmem:[%s2948_s14 + $0xd0] sm:$0xff] %v2497_v62   ;;  %v1180_v5 = vadd.f32 %v1179_v2, %v1010_v1  ;;  %v1535_v8 = vmul.f32 %v2923_v63, %v1258_v4 }
 0x16d   : > { %v1504_v7 = vmul.f32 %v2923_v63, %v1180_v5  ;;  %v1603_v17 = vadd.f32 %v2929_v3, %v1535_v8 }
 0x16f   : > { %v1572_v9 = vadd.f32 %v2929_v3, %v1504_v7  ;;  %v1090_v10 = vpop.f32.mrf.mxu2  ;;  %v1667_v22 = vmax.f32 %v1603_v17, 0.0  ;;  %v2630_v17 = vld [vmem:[%s3182_s2] ss:$0 sm:$0xff] }
 0x170   : > { %v1259_v11 = vpop.f32.mrf.mxu3 }
 0x171   : > { %v1636_v13 = vmax.f32 %v1572_v9, 0.0  ;;  %v1260_v14 = vadd.f32 %v1259_v11, %v1090_v10  ;;  %v1013_v15 = vpop.f32.mrf.mxu0 }
 0x172   : > { %v1182_v16 = vpop.f32.mrf.mxu1 }
 0x173   : > { %v2422_v18 = vpack.c.bf16 %v1636_v13, %v1635_v12  ;;  %v1536_v19 = vmul.f32 %v2923_v63, %v1260_v14  ;;  %v1183_v21 = vadd.f32 %v1182_v16, %v1013_v15 }
 0x175   : > { %2534 = vst [vmem:[%s2948_s14 + $0x58] sm:$0xff] %v2422_v18   ;;  %v1604_v20 = vadd.f32 %v2929_v3, %v1536_v19  ;;  %v1505_v27 = vmul.f32 %v2923_v63, %v1183_v21 }
 0x177   : > { %v1668_v23 = vmax.f32 %v1604_v20, 0.0  ;;  %v1093_v24 = vpop.f32.mrf.mxu2  ;;  %v1573_v32 = vadd.f32 %v2929_v3, %v1505_v27 }
 0x178   : > { %v1262_v25 = vpop.f32.mrf.mxu3 }
 0x179   : > { %v2502_v26 = vpack.c.bf16 %v1668_v23, %v1667_v22  ;;  %v1015_v28 = vpop.f32.mrf.mxu0  ;;  %v1263_v30 = vadd.f32 %v1262_v25, %v1093_v24  ;;  %v1637_v38 = vmax.f32 %v1573_v32, 0.0 }
 0x17a   : > { %v1184_v29 = vpop.f32.mrf.mxu1 }
 0x17b   : > { %2550 = vst [vmem:[%s2948_s14 + $0xd8] sm:$0xff] %v2502_v26   ;;  %v1185_v31 = vadd.f32 %v1184_v29, %v1015_v28  ;;  %v1537_v34 = vmul.f32 %v2923_v63, %v1263_v30 }
 0x17d   : > { %v1506_v33 = vmul.f32 %v2923_v63, %v1185_v31  ;;  %v1605_v43 = vadd.f32 %v2929_v3, %v1537_v34 }
 0x17f   : > { %v1574_v35 = vadd.f32 %v2929_v3, %v1506_v33  ;;  %v1095_v36 = vpop.f32.mrf.mxu2  ;;  %v1669_v48 = vmax.f32 %v1605_v43, 0.0 }
 0x180   : > { %v1264_v37 = vpop.f32.mrf.mxu3 }
 0x181   : > { %v1638_v39 = vmax.f32 %v1574_v35, 0.0  ;;  %v1265_v40 = vadd.f32 %v1264_v37, %v1095_v36  ;;  %v1018_v41 = vpop.f32.mrf.mxu0 }
 0x182   : > { %v1187_v42 = vpop.f32.mrf.mxu1 }
 0x183   : > { %v2427_v44 = vpack.c.bf16 %v1638_v39, %v1637_v38  ;;  %v1538_v45 = vmul.f32 %v2923_v63, %v1265_v40  ;;  %v1188_v47 = vadd.f32 %v1187_v42, %v1018_v41 }
 0x185   : > { %2535 = vst [vmem:[%s2948_s14 + $0x60] sm:$0xff] %v2427_v44   ;;  %v1606_v46 = vadd.f32 %v2929_v3, %v1538_v45  ;;  %v1507_v53 = vmul.f32 %v2923_v63, %v1188_v47 }
 0x187   : > { %v1670_v49 = vmax.f32 %v1606_v46, 0.0  ;;  %v1098_v50 = vpop.f32.mrf.mxu2  ;;  %v1575_v58 = vadd.f32 %v2929_v3, %v1507_v53 }
 0x188   : > { %v1267_v51 = vpop.f32.mrf.mxu3 }
 0x189   : > { %v2507_v52 = vpack.c.bf16 %v1670_v49, %v1669_v48  ;;  %v1020_v54 = vpop.f32.mrf.mxu0  ;;  %v1268_v56 = vadd.f32 %v1267_v51, %v1098_v50  ;;  %v1639_v1 = vmax.f32 %v1575_v58, 0.0 }
 0x18a   : > { %v1189_v55 = vpop.f32.mrf.mxu1 }
 0x18b   : > { %2551 = vst [vmem:[%s2948_s14 + $0xe0] sm:$0xff] %v2507_v52   ;;  %v1190_v57 = vadd.f32 %v1189_v55, %v1020_v54  ;;  %v1539_v60 = vmul.f32 %v2923_v63, %v1268_v56 }
 0x18d   : > { %v1508_v59 = vmul.f32 %v2923_v63, %v1190_v57  ;;  %v1607_v7 = vadd.f32 %v2929_v3, %v1539_v60 }
 0x18f   : > { %v1576_v61 = vadd.f32 %v2929_v3, %v1508_v59  ;;  %v1100_v62 = vpop.f32.mrf.mxu2  ;;  %v1671_v12 = vmax.f32 %v1607_v7, 0.0 }
 0x190   : > { %v1269_v0 = vpop.f32.mrf.mxu3 }
 0x191   : > { %v1640_v2 = vmax.f32 %v1576_v61, 0.0  ;;  %v1270_v4 = vadd.f32 %v1269_v0, %v1100_v62  ;;  %v1023_v5 = vpop.f32.mrf.mxu0 }
 0x192   : > { %v1192_v6 = vpop.f32.mrf.mxu1 }
 0x193   : > { %v2432_v8 = vpack.c.bf16 %v1640_v2, %v1639_v1  ;;  %v1540_v9 = vmul.f32 %v2923_v63, %v1270_v4  ;;  %v1193_v11 = vadd.f32 %v1192_v6, %v1023_v5  ;;  %v2631_v63 = vld [vmem:[%s3183_s3] ss:$0 sm:$0xff] }
 0x195   : > { %2536 = vst [vmem:[%s2948_s14 + $0x68] sm:$0xff] %v2432_v8   ;;  %v1608_v10 = vadd.f32 %v2929_v3, %v1540_v9  ;;  %v1509_v18 = vmul.f32 %v2630_v17, %v1193_v11 }
 0x197   : > { %v1672_v13 = vmax.f32 %v1608_v10, 0.0  ;;  %v1103_v14 = vpop.f32.mrf.mxu2  ;;  %v1577_v3 = vadd.f32 %v2631_v63, %v1509_v18 }
 0x198   : > { %v1272_v15 = vpop.f32.mrf.mxu3 }
 0x199   : > { %v2512_v16 = vpack.c.bf16 %v1672_v13, %v1671_v12  ;;  %v1025_v19 = vpop.f32.mrf.mxu0  ;;  %v1273_v21 = vadd.f32 %v1272_v15, %v1103_v14  ;;  %v1641_v28 = vmax.f32 %v1577_v3, 0.0 }
 0x19a   : > { %v1194_v20 = vpop.f32.mrf.mxu1 }
 0x19b   : > { %2552 = vst [vmem:[%s2948_s14 + $0xe8] sm:$0xff] %v2512_v16   ;;  %v1195_v22 = vadd.f32 %v1194_v20, %v1025_v19  ;;  %v1541_v24 = vmul.f32 %v2630_v17, %v1273_v21 }
 0x19d   : > { %v1510_v23 = vmul.f32 %v2630_v17, %v1195_v22  ;;  %v1609_v33 = vadd.f32 %v2631_v63, %v1541_v24 }
 0x19f   : > { %v1578_v25 = vadd.f32 %v2631_v63, %v1510_v23  ;;  %v1105_v26 = vpop.f32.mrf.mxu2  ;;  %v1673_v38 = vmax.f32 %v1609_v33, 0.0 }
 0x1a0   : > { %v1274_v27 = vpop.f32.mrf.mxu3 }
 0x1a1   : > { %v1642_v29 = vmax.f32 %v1578_v25, 0.0  ;;  %v1275_v30 = vadd.f32 %v1274_v27, %v1105_v26  ;;  %v1028_v31 = vpop.f32.mrf.mxu0 }
 0x1a2   : > { %v1197_v32 = vpop.f32.mrf.mxu1 }
 0x1a3   : > { %v2437_v34 = vpack.c.bf16 %v1642_v29, %v1641_v28  ;;  %v1542_v35 = vmul.f32 %v2630_v17, %v1275_v30  ;;  %v1198_v37 = vadd.f32 %v1197_v32, %v1028_v31 }
 0x1a5   : > { %2537 = vst [vmem:[%s2948_s14 + $0x70] sm:$0xff] %v2437_v34   ;;  %v1610_v36 = vadd.f32 %v2631_v63, %v1542_v35  ;;  %v1511_v43 = vmul.f32 %v2630_v17, %v1198_v37 }
 0x1a7   : > { %v1674_v39 = vmax.f32 %v1610_v36, 0.0  ;;  %v1108_v40 = vpop.f32.mrf.mxu2  ;;  %v1579_v48 = vadd.f32 %v2631_v63, %v1511_v43 }
 0x1a8   : > { %v1277_v41 = vpop.f32.mrf.mxu3 }
 0x1a9   : > { %v2517_v42 = vpack.c.bf16 %v1674_v39, %v1673_v38  ;;  %v1030_v44 = vpop.f32.mrf.mxu0  ;;  %v1278_v46 = vadd.f32 %v1277_v41, %v1108_v40  ;;  %v1643_v54 = vmax.f32 %v1579_v48, 0.0 }
 0x1aa   : > { %v1199_v45 = vpop.f32.mrf.mxu1 }
 0x1ab   : > { %2553 = vst [vmem:[%s2948_s14 + $0xf0] sm:$0xff] %v2517_v42   ;;  %v1200_v47 = vadd.f32 %v1199_v45, %v1030_v44  ;;  %v1543_v50 = vmul.f32 %v2630_v17, %v1278_v46 }
 0x1ad   : > { %v1512_v49 = vmul.f32 %v2630_v17, %v1200_v47  ;;  %v1611_v57 = vadd.f32 %v2631_v63, %v1543_v50 }
 0x1af   : > { %v1580_v51 = vadd.f32 %v2631_v63, %v1512_v49  ;;  %v1110_v52 = vpop.f32.mrf.mxu2  ;;  %v1675_v61 = vmax.f32 %v1611_v57, 0.0 }
 0x1b0   : > { %v1279_v53 = vpop.f32.mrf.mxu3 }
 0x1b1   : > { %v1644_v55 = vmax.f32 %v1580_v51, 0.0  ;;  %v1280_v56 = vadd.f32 %v1279_v53, %v1110_v52 }
 0x1b3   : > { %v2442_v58 = vpack.c.bf16 %v1644_v55, %v1643_v54  ;;  %v1544_v59 = vmul.f32 %v2630_v17, %v1280_v56 }
 0x1b5   : > { %2538 = vst [vmem:[%s2948_s14 + $0x78] sm:$0xff] %v2442_v58   ;;  %v1612_v60 = vadd.f32 %v2631_v63, %v1544_v59 }
 0x1b7   : > { %v1676_v62 = vmax.f32 %v1612_v60, 0.0 }
 0x1b9   : > { %v2522_v0 = vpack.c.bf16 %v1676_v62, %v1675_v61 }
 0x1bb   : > { %2554 = vst [vmem:[%s2948_s14 + $0xf8] sm:$0xff] %v2522_v0  }
 0x1bc   : > { %2659 = shalt.err (!%p2656_p5)
}
 0x1bd   : > { %s2712_s12 = smov 64   ;;  %s2713_s14 = smov 4  }
 0x1be   : > { %2571 = dma.vmem_to_hbm [thread:$0]  (%p2779_p4), %s1820_s7, 4096, %s1822_s8, %s1806_s18, %s2712_s12, %s2712_s12, %s2713_s14  }
 0x1bf PF: > { %p2577_p6 = scmp.ge.s32.totalorder %s2710_s20, 2  ;;  %s1836_s21 = sand.u32 1, %s2690_s15  }
 0x1c0   : > { %s1837_s29 = scalar_lea.sflag [#allocation4], %s1836_s21 }
 0x1c1   : > { %p2574_p7 = pnand %p2577_p6, %p2786_p8 }
 0x1c3   : > { %p2575_p9 = pneg %p2574_p7 }
 0x1c5   : > { %2685 = dma.done.wait (%p2575_p9), %s1837_s29, 4096  }
 0x1c6   : > { %2687 = vsyncadd (%p2575_p9), %s1837_s29, 4294963200  ;;  %s17_s20 = sadd.s32 1, %s2710_s20   ;;  %s3187_s15 = smov %s2694_s16 }
 0x1c7   : > { %p14_p10 = scmp.ge.s32.totalorder %s17_s20, 6   ;;  %s3188_s16 = smov %s2698_s17 }
 0x1c8   : > { %s3189_s17 = smov %s2792_s28  ;;  %s3190_s18 = smov %s2706_s19 }
 0x1c9   : > { %s3191_s19 = smov %s3193_s23  ;;  %16 = sbr.rel (!%p14_p10) target bundleno = 4 (0x4), region = 88 }
 0x1ce   :  { %1843 = vsyncpa [#allocation4], 1 }
 0x1cf   :  { %1845 = vsyncpa [#allocation4 + $0x1], 1 }

</bundles_post_ra>
